<compile_context>
chip_gen: v6e
topology: v6e:2x2x1
jax: 0.10.0
libtpu: 0.0.40
codegen_flags: <defaults>
</compile_context>

<pallas_src>
import functools
import math

import jax
import jax.numpy as jnp
from jax import lax
from jax.experimental import pallas as pl
from jax.experimental.pallas import tpu as pltpu


def _mhs_kernel(
    # ---- per-batch inputs ----
    embed_ref,        # (1, L, E)  f32 token embeddings
    mask_ref,         # (1, 1, L)  f32 (context > 0)
    # ---- weights (pre-transposed to [in, out] in the wrapper) ----
    wih_f_ref, whh_f_ref, b_f_ref,    # (E,4H), (H,4H), (1,4H)  forward LSTM
    wih_b_ref, whh_b_ref, b_b_ref,    # (E,4H), (H,4H), (1,4H)  backward LSTM
    w_nh_ref, b_nh_ref,               # (2H,H), (1,H)   ner_hid
    w_no_ref, b_no_ref,               # (H,T),  (1,T)   ner_out
    ner_emb_ref,                      # (T, Ne)         ner_embedding table
    wu_rep_ref, wu_ner_ref, bu_ref,   # (2H,H), (Ne,H), (1,H)  select_u (split)
    ww_rep_ref, ww_ner_ref, bw_ref,   # (2H,H), (Ne,H), (1,H)  select_w (split)
    vu_ref, vw_ref, bv_ref,           # (R,H), (R,H), (R,1)    select_v (split)
    # ---- outputs ----
    ner_pred_ref,     # (1, 1, L)       int32
    rela_pred_ref,    # (1, R, L, L)    int8   (lane-dense: L on lanes)
    # ---- scratch ----
    xg_f_ref,         # (L, 4H) f32  input-gate preactivations, fwd
    xg_b_ref,         # (L, 4H) f32  input-gate preactivations, bwd
    rep_ref,          # (L, 2H) f32  [fwd hidden | bwd hidden]
    *,
    hidden_size,
    chunk,
    logit_threshold,
):
    f32 = jnp.float32
    H = hidden_size
    L = embed_ref.shape[1]
    T = ner_emb_ref.shape[0]
    CH = chunk

    x = embed_ref[0]  # [L, E]

    # Input contribution to the LSTM gates for the whole sequence (MXU).
    xg_f_ref[...] = jnp.dot(x, wih_f_ref[...], preferred_element_type=f32) + b_f_ref[...]
    xg_b_ref[...] = jnp.dot(x, wih_b_ref[...], preferred_element_type=f32) + b_b_ref[...]

    whh_f = whh_f_ref[...]
    whh_b = whh_b_ref[...]

    def lstm_cell(gx, h, c, whh):
        # PyTorch gate order: i, f, g, o
        gates = gx + jnp.dot(h, whh, preferred_element_type=f32)  # [1, 4H]
        i = jax.nn.sigmoid(gates[:, 0:H])
        f = jax.nn.sigmoid(gates[:, H:2 * H])
        g = jnp.tanh(gates[:, 2 * H:3 * H])
        o = jax.nn.sigmoid(gates[:, 3 * H:4 * H])
        c_new = f * c + i * g
        h_new = o * jnp.tanh(c_new)
        return h_new, c_new

    h0 = jnp.zeros((1, H), f32)
    c0 = jnp.zeros((1, H), f32)

    # ---- forward direction: chunked (aligned) loads/stores, unrolled cells ----
    def fwd_chunk(gidx, carry):
        h, c = carry
        base = pl.multiple_of(gidx * CH, CH)
        gx = xg_f_ref[pl.ds(base, CH), :]          # [CH, 4H]
        hs = []
        for k in range(CH):                        # static unroll
            h, c = lstm_cell(gx[k:k + 1, :], h, c, whh_f)
            hs.append(h)
        rep_ref[pl.ds(base, CH), 0:H] = jnp.concatenate(hs, axis=0)
        return (h, c)

    lax.fori_loop(0, L // CH, fwd_chunk, (h0, c0))

    # ---- backward direction ----
    def bwd_chunk(gidx, carry):
        h, c = carry
        base = pl.multiple_of(L - (gidx + 1) * CH, CH)
        gx = xg_b_ref[pl.ds(base, CH), :]          # [CH, 4H]
        hs = [None] * CH
        for k in range(CH - 1, -1, -1):            # static unroll, reversed
            h, c = lstm_cell(gx[k:k + 1, :], h, c, whh_b)
            hs[k] = h
        rep_ref[pl.ds(base, CH), H:2 * H] = jnp.concatenate(hs, axis=0)
        return (h, c)

    lax.fori_loop(0, L // CH, bwd_chunk, (h0, c0))

    rep = rep_ref[...]  # [L, 2H]  (shared scratch, no concat)

    # ---- NER head: Linear -> tanh -> Linear ----
    ner_hid = jnp.tanh(
        jnp.dot(rep, w_nh_ref[...], preferred_element_type=f32) + b_nh_ref[...])
    ner_score = (
        jnp.dot(ner_hid, w_no_ref[...], preferred_element_type=f32) + b_no_ref[...])  # [L,T]

    # softmax is monotone -> argmax directly on logits (first-max tie break)
    mx = jnp.max(ner_score, axis=-1, keepdims=True)
    iota_t = lax.broadcasted_iota(jnp.int32, (L, T), 1)
    ner_pred = jnp.min(jnp.where(ner_score == mx, iota_t, T), axis=-1)  # [L] int32
    ner_pred_ref[0, 0, :] = ner_pred

    # ---- NER-tag embedding lookup via one-hot matmul ----
    onehot = (iota_t == ner_pred[:, None]).astype(f32)                        # [L, T]
    ner_embed = jnp.dot(onehot, ner_emb_ref[...], preferred_element_type=f32)  # [L, Ne]

    # ---- selection projections: tanh([rep | ner_embed] @ W + b) ----
    su = jnp.tanh(
        jnp.dot(rep, wu_rep_ref[...], preferred_element_type=f32)
        + jnp.dot(ner_embed, wu_ner_ref[...], preferred_element_type=f32)
        + bu_ref[...])                                                         # [L, H] (j)
    sw = jnp.tanh(
        jnp.dot(rep, ww_rep_ref[...], preferred_element_type=f32)
        + jnp.dot(ner_embed, ww_ner_ref[...], preferred_element_type=f32)
        + bw_ref[...])                                                         # [L, H] (i)

    # select_v(cat(u_j, w_i))[r] = u_j . Vu[r] + w_i . Vw[r] + bv[r]
    # Computed lane-dense: [R, L] so the pairwise tensor is [R, L, L] with L on lanes.
    dn = (((1,), (1,)), ((), ()))
    uT = lax.dot_general(vu_ref[...], su, dimension_numbers=dn,
                         preferred_element_type=f32)                 # [R, L]  (j)
    wT = lax.dot_general(vw_ref[...], sw, dimension_numbers=dn,
                         preferred_element_type=f32) + bv_ref[...]   # [R, L]  (i)

    score = wT[:, :, None] + uT[:, None, :]                          # [R, L, L]

    # sigmoid(s)*mask > th  <=>  (s > logit(th)) & mask   (for th in (0,1))
    m = mask_ref[0, 0, :]                                            # [L]
    pair = (m[:, None] > 0.0) & (m[None, :] > 0.0)                   # [L, L]
    rela_pred_ref[0] = (
        (score > logit_threshold) & pair[None, :, :]).astype(jnp.int8)


def init_params(key, *, vocab_size, embed_size, ner_embed_size, hidden_size,
                num_ner_tag, num_rela):
    ks = jax.random.split(key, 20)

    def w(k, shape, scale=0.1):
        return jax.random.normal(k, shape, jnp.float32) * scale

    H, E, Ne, T, R = hidden_size, embed_size, ner_embed_size, num_ner_tag, num_rela
    return dict(
        embedding=w(ks[0], (vocab_size, E)),
        ner_embedding=w(ks[1], (T, Ne)),
        lstm_w_ih_f=w(ks[2], (4 * H, E)),
        lstm_w_hh_f=w(ks[3], (4 * H, H)),
        lstm_b_ih_f=w(ks[4], (4 * H,)),
        lstm_b_hh_f=w(ks[5], (4 * H,)),
        lstm_w_ih_b=w(ks[6], (4 * H, E)),
        lstm_w_hh_b=w(ks[7], (4 * H, H)),
        lstm_b_ih_b=w(ks[8], (4 * H,)),
        lstm_b_hh_b=w(ks[9], (4 * H,)),
        ner_hid_w=w(ks[10], (H, 2 * H)),
        ner_hid_b=w(ks[11], (H,)),
        ner_out_w=w(ks[12], (T, H)),
        ner_out_b=w(ks[13], (T,)),
        select_u_w=w(ks[14], (H, 2 * H + Ne)),
        select_u_b=w(ks[15], (H,)),
        select_w_w=w(ks[16], (H, 2 * H + Ne)),
        select_w_b=w(ks[17], (H,)),
        select_v_w=w(ks[18], (R, 2 * H)),
        select_v_b=w(ks[19], (R,)),
    )


def multi_head_selection_forward(context, params, *, hidden_size, rela_threshold=0.5):
    """context: [B, L] int32 token ids (0 = pad).
    Returns (ner_pred [B,L] int32, rela_pred [B,L,L,R] int32)."""
    B, L = context.shape
    H = hidden_size
    E = params["embedding"].shape[1]
    T, Ne = params["ner_embedding"].shape
    R = params["select_v_w"].shape[0]
    f32 = jnp.float32

    assert 0.0 < rela_threshold < 1.0
    logit_th = float(math.log(rela_threshold / (1.0 - rela_threshold)))

    # Glue: embedding gather + mask (in_dropout is identity at inference).
    embed = jnp.take(params["embedding"], context, axis=0).astype(f32)  # [B, L, E]
    mask = (context > 0).astype(f32).reshape(B, 1, L)

    # Pre-transpose weights to [in, out]; fold LSTM bias pairs; split select_* weights.
    wih_f = params["lstm_w_ih_f"].T
    whh_f = params["lstm_w_hh_f"].T
    b_f = (params["lstm_b_ih_f"] + params["lstm_b_hh_f"]).reshape(1, 4 * H)
    wih_b = params["lstm_w_ih_b"].T
    whh_b = params["lstm_w_hh_b"].T
    b_b = (params["lstm_b_ih_b"] + params["lstm_b_hh_b"]).reshape(1, 4 * H)
    w_nh = params["ner_hid_w"].T
    b_nh = params["ner_hid_b"].reshape(1, H)
    w_no = params["ner_out_w"].T
    b_no = params["ner_out_b"].reshape(1, T)
    wu_rep = params["select_u_w"][:, :2 * H].T      # [2H, H]
    wu_ner = params["select_u_w"][:, 2 * H:].T      # [Ne, H]
    bu = params["select_u_b"].reshape(1, H)
    ww_rep = params["select_w_w"][:, :2 * H].T      # [2H, H]
    ww_ner = params["select_w_w"][:, 2 * H:].T      # [Ne, H]
    bw = params["select_w_b"].reshape(1, H)
    vu = params["select_v_w"][:, :H]                # [R, H]
    vw = params["select_v_w"][:, H:]                # [R, H]
    bv = params["select_v_b"].reshape(R, 1)
    ner_emb = params["ner_embedding"]

    # LSTM unroll chunk (aligned (chunk, 4H) loads / (chunk, H) stores).
    chunk = 8 if L % 8 == 0 else (4 if L % 4 == 0 else (2 if L % 2 == 0 else 1))

    kernel = functools.partial(
        _mhs_kernel, hidden_size=H, chunk=chunk, logit_threshold=logit_th)

    def full(arr):
        nd = arr.ndim
        return pl.BlockSpec(arr.shape, lambda bb, _nd=nd: (0,) * _nd)

    in_specs = [
        pl.BlockSpec((1, L, E), lambda bb: (bb, 0, 0)),   # embed
        pl.BlockSpec((1, 1, L), lambda bb: (bb, 0, 0)),   # mask
        full(wih_f), full(whh_f), full(b_f),
        full(wih_b), full(whh_b), full(b_b),
        full(w_nh), full(b_nh), full(w_no), full(b_no),
        full(ner_emb),
        full(wu_rep), full(wu_ner), full(bu),
        full(ww_rep), full(ww_ner), full(bw),
        full(vu), full(vw), full(bv),
    ]
    out_shape = (
        jax.ShapeDtypeStruct((B, 1, L), jnp.int32),
        jax.ShapeDtypeStruct((B, R, L, L), jnp.int8),     # lane-dense, int8
    )
    out_specs = (
        pl.BlockSpec((1, 1, L), lambda bb: (bb, 0, 0)),
        pl.BlockSpec((1, R, L, L), lambda bb: (bb, 0, 0, 0)),
    )
    scratch_shapes = [
        pltpu.VMEM((L, 4 * H), f32),   # xg forward
        pltpu.VMEM((L, 4 * H), f32),   # xg backward
        pltpu.VMEM((L, 2 * H), f32),   # shared rep [fwd | bwd]
    ]

    # Advisory cost estimate (helps XLA schedule the surrounding gather/mask ops).
    lstm_flops = 2 * 2 * L * (E + H) * 4 * H
    head_flops = 2 * L * (2 * H * H + H * T + T * Ne)
    sel_flops = 2 * L * (2 * ((2 * H) * H + Ne * H) + 2 * H * R)
    pair_flops = 2 * R * L * L
    weight_bytes = 4 * int(sum(int(a.size) for a in (
        wih_f, whh_f, b_f, wih_b, whh_b, b_b, w_nh, b_nh, w_no, b_no, ner_emb,
        wu_rep, wu_ner, bu, ww_rep, ww_ner, bw, vu, vw, bv)))
    cost = pl.CostEstimate(
        flops=int(B * (lstm_flops + head_flops + sel_flops + pair_flops)),
        transcendentals=int(B * (2 * L * 5 * H + 3 * L * H)),
        bytes_accessed=int(4 * embed.size + 4 * mask.size + weight_bytes
                           + 4 * B * L + B * R * L * L),
    )

    ner_pred, rela_rll = pl.pallas_call(
        kernel,
        out_shape=out_shape,
        grid_spec=pltpu.PrefetchScalarGridSpec(
            num_scalar_prefetch=0,
            grid=(B,),
            in_specs=in_specs,
            out_specs=out_specs,
            scratch_shapes=scratch_shapes,
        ),
        compiler_params=pltpu.CompilerParams(
            # Batch elements are independent -> shard across v7x TensorCores.
            dimension_semantics=("parallel",),
            # Raised scoped-VMEM limit (defaults: 16 MiB v5e / 32 MiB v6e,v7x).
            vmem_limit_bytes=64 * 1024 * 1024,
        ),
        cost_estimate=cost,
    )(embed, mask, wih_f, whh_f, b_f, wih_b, whh_b, b_b,
      w_nh, b_nh, w_no, b_no, ner_emb,
      wu_rep, wu_ner, bu, ww_rep, ww_ner, bw, vu, vw, bv)

    # Wrapper-side relayout back to the module's [B, L, L, R] int32 contract.
    rela_pred = jnp.transpose(rela_rll, (0, 2, 3, 1)).astype(jnp.int32)
    return ner_pred.reshape(B, L), rela_pred


if __name__ == "__main__":
    # Small, deterministic configuration.
    B, L = 2, 8
    vocab_size = 50
    embed_size = 16
    ner_embed_size = 8
    hidden_size = 16      # NOTE: multiples of 256 for H/2H best feed the v6e/v7x MXU.
    num_ner_tag = 5
    num_rela = 6

    key = jax.random.PRNGKey(0)
    k_ctx, k_params = jax.random.split(key)

    params = init_params(
        k_params,
        vocab_size=vocab_size,
        embed_size=embed_size,
        ner_embed_size=ner_embed_size,
        hidden_size=hidden_size,
        num_ner_tag=num_ner_tag,
        num_rela=num_rela,
    )

    # All token ids > 0  => full-length sequences (mask all True).
    context = jax.random.randint(k_ctx, (B, L), 1, vocab_size, dtype=jnp.int32)

    ner_pred, rela_pred = multi_head_selection_forward(
        context, params, hidden_size=hidden_size, rela_threshold=0.5)

    jax.block_until_ready((ner_pred, rela_pred))

    assert ner_pred.shape == (B, L)
    assert rela_pred.shape == (B, L, L, num_rela)
    print("KERNEL_OK")
</pallas_src>

<mosaic_0001>
module attributes {stable_mosaic.version = 11 : i64} {
  func.func @_mhs_kernel(%arg0: i32, %arg1: memref<1x8x16xf32, #tpu.memory_space<vmem>>, %arg2: memref<1x1x8xf32, #tpu.memory_space<vmem>>, %arg3: memref<16x64xf32, #tpu.memory_space<vmem>>, %arg4: memref<16x64xf32, #tpu.memory_space<vmem>>, %arg5: memref<1x64xf32, #tpu.memory_space<vmem>>, %arg6: memref<16x64xf32, #tpu.memory_space<vmem>>, %arg7: memref<16x64xf32, #tpu.memory_space<vmem>>, %arg8: memref<1x64xf32, #tpu.memory_space<vmem>>, %arg9: memref<32x16xf32, #tpu.memory_space<vmem>>, %arg10: memref<1x16xf32, #tpu.memory_space<vmem>>, %arg11: memref<16x5xf32, #tpu.memory_space<vmem>>, %arg12: memref<1x5xf32, #tpu.memory_space<vmem>>, %arg13: memref<5x8xf32, #tpu.memory_space<vmem>>, %arg14: memref<32x16xf32, #tpu.memory_space<vmem>>, %arg15: memref<8x16xf32, #tpu.memory_space<vmem>>, %arg16: memref<1x16xf32, #tpu.memory_space<vmem>>, %arg17: memref<32x16xf32, #tpu.memory_space<vmem>>, %arg18: memref<8x16xf32, #tpu.memory_space<vmem>>, %arg19: memref<1x16xf32, #tpu.memory_space<vmem>>, %arg20: memref<6x16xf32, #tpu.memory_space<vmem>>, %arg21: memref<6x16xf32, #tpu.memory_space<vmem>>, %arg22: memref<6x1xf32, #tpu.memory_space<vmem>>, %arg23: memref<1x1x8xi32, #tpu.memory_space<vmem>>, %arg24: memref<1x6x8x8xi8, #tpu.memory_space<vmem>>, %arg25: memref<8x64xf32, #tpu.memory_space<vmem>>, %arg26: memref<8x64xf32, #tpu.memory_space<vmem>>, %arg27: memref<8x32xf32, #tpu.memory_space<vmem>>) attributes {dimension_semantics = [#tpu.dimension_semantics<parallel>], iteration_bounds = array<i64: 2>, scalar_prefetch = 0 : i64, scratch_operands = 3 : i64, tpu.core_type = #tpu.core_type<tc>, window_params = [{transform_indices = @transform_0, window_bounds = array<i64: 1, 8, 16>}, {transform_indices = @transform_1, window_bounds = array<i64: 1, 1, 8>}, {pipeline_mode = #tpu.pipeline_mode<synchronous>, transform_indices = @transform_2, window_bounds = array<i64: 16, 64>}, {pipeline_mode = #tpu.pipeline_mode<synchronous>, transform_indices = @transform_3, window_bounds = array<i64: 16, 64>}, {pipeline_mode = #tpu.pipeline_mode<synchronous>, transform_indices = @transform_4, window_bounds = array<i64: 1, 64>}, {pipeline_mode = #tpu.pipeline_mode<synchronous>, transform_indices = @transform_5, window_bounds = array<i64: 16, 64>}, {pipeline_mode = #tpu.pipeline_mode<synchronous>, transform_indices = @transform_6, window_bounds = array<i64: 16, 64>}, {pipeline_mode = #tpu.pipeline_mode<synchronous>, transform_indices = @transform_7, window_bounds = array<i64: 1, 64>}, {pipeline_mode = #tpu.pipeline_mode<synchronous>, transform_indices = @transform_8, window_bounds = array<i64: 32, 16>}, {pipeline_mode = #tpu.pipeline_mode<synchronous>, transform_indices = @transform_9, window_bounds = array<i64: 1, 16>}, {pipeline_mode = #tpu.pipeline_mode<synchronous>, transform_indices = @transform_10, window_bounds = array<i64: 16, 5>}, {pipeline_mode = #tpu.pipeline_mode<synchronous>, transform_indices = @transform_11, window_bounds = array<i64: 1, 5>}, {pipeline_mode = #tpu.pipeline_mode<synchronous>, transform_indices = @transform_12, window_bounds = array<i64: 5, 8>}, {pipeline_mode = #tpu.pipeline_mode<synchronous>, transform_indices = @transform_13, window_bounds = array<i64: 32, 16>}, {pipeline_mode = #tpu.pipeline_mode<synchronous>, transform_indices = @transform_14, window_bounds = array<i64: 8, 16>}, {pipeline_mode = #tpu.pipeline_mode<synchronous>, transform_indices = @transform_15, window_bounds = array<i64: 1, 16>}, {pipeline_mode = #tpu.pipeline_mode<synchronous>, transform_indices = @transform_16, window_bounds = array<i64: 32, 16>}, {pipeline_mode = #tpu.pipeline_mode<synchronous>, transform_indices = @transform_17, window_bounds = array<i64: 8, 16>}, {pipeline_mode = #tpu.pipeline_mode<synchronous>, transform_indices = @transform_18, window_bounds = array<i64: 1, 16>}, {pipeline_mode = #tpu.pipeline_mode<synchronous>, transform_indices = @transform_19, window_bounds = array<i64: 6, 16>}, {pipeline_mode = #tpu.pipeline_mode<synchronous>, transform_indices = @transform_20, window_bounds = array<i64: 6, 16>}, {pipeline_mode = #tpu.pipeline_mode<synchronous>, transform_indices = @transform_21, window_bounds = array<i64: 6, 1>}, {transform_indices = @transform_22, window_bounds = array<i64: 1, 1, 8>}, {transform_indices = @transform_23, window_bounds = array<i64: 1, 6, 8, 8>}]} {
    %c0 = arith.constant 0 : index
    %c0_0 = arith.constant 0 : index
    %c0_1 = arith.constant 0 : index
    %0 = vector.load %arg1[%c0, %c0_0, %c0_1] : memref<1x8x16xf32, #tpu.memory_space<vmem>>, vector<1x8x16xf32>
    %1 = vector.shape_cast %0 : vector<1x8x16xf32> to vector<8x16xf32>
    %c0_2 = arith.constant 0 : index
    %c0_3 = arith.constant 0 : index
    %2 = vector.load %arg3[%c0_2, %c0_3] : memref<16x64xf32, #tpu.memory_space<vmem>>, vector<16x64xf32>
    %cst = arith.constant dense<0.000000e+00> : vector<8x64xf32>
    %3 = tpu.matmul %1, %2, %cst {dimension_numbers = #tpu.dot_dimension_numbers<[1], [0], [0], [1], [0, 0, 1, 1], [], []>} : vector<8x16xf32>, vector<16x64xf32>, vector<8x64xf32> -> vector<8x64xf32>
    %c0_4 = arith.constant 0 : index
    %c0_5 = arith.constant 0 : index
    %4 = vector.load %arg5[%c0_4, %c0_5] : memref<1x64xf32, #tpu.memory_space<vmem>>, vector<1x64xf32>
    %5 = vector.broadcast %4 : vector<1x64xf32> to vector<8x64xf32>
    %6 = arith.addf %3, %5 : vector<8x64xf32>
    %c0_6 = arith.constant 0 : index
    %c0_7 = arith.constant 0 : index
    %7 = vector.load %arg25[%c0_6, %c0_7] : memref<8x64xf32, #tpu.memory_space<vmem>>, vector<8x64xf32>
    tpu.vector_store %arg25[%c0_6, %c0_7], %6 {strides = array<i32>} : memref<8x64xf32, #tpu.memory_space<vmem>>, vector<8x64xf32>,
    %c0_8 = arith.constant 0 : index
    %c0_9 = arith.constant 0 : index
    %8 = vector.load %arg6[%c0_8, %c0_9] : memref<16x64xf32, #tpu.memory_space<vmem>>, vector<16x64xf32>
    %cst_10 = arith.constant dense<0.000000e+00> : vector<8x64xf32>
    %9 = tpu.matmul %1, %8, %cst_10 {dimension_numbers = #tpu.dot_dimension_numbers<[1], [0], [0], [1], [0, 0, 1, 1], [], []>} : vector<8x16xf32>, vector<16x64xf32>, vector<8x64xf32> -> vector<8x64xf32>
    %c0_11 = arith.constant 0 : index
    %c0_12 = arith.constant 0 : index
    %10 = vector.load %arg8[%c0_11, %c0_12] : memref<1x64xf32, #tpu.memory_space<vmem>>, vector<1x64xf32>
    %11 = vector.broadcast %10 : vector<1x64xf32> to vector<8x64xf32>
    %12 = arith.addf %9, %11 : vector<8x64xf32>
    %c0_13 = arith.constant 0 : index
    %c0_14 = arith.constant 0 : index
    %13 = vector.load %arg26[%c0_13, %c0_14] : memref<8x64xf32, #tpu.memory_space<vmem>>, vector<8x64xf32>
    tpu.vector_store %arg26[%c0_13, %c0_14], %12 {strides = array<i32>} : memref<8x64xf32, #tpu.memory_space<vmem>>, vector<8x64xf32>,
    %c0_15 = arith.constant 0 : index
    %c0_16 = arith.constant 0 : index
    %14 = vector.load %arg4[%c0_15, %c0_16] : memref<16x64xf32, #tpu.memory_space<vmem>>, vector<16x64xf32>
    %c0_17 = arith.constant 0 : index
    %c0_18 = arith.constant 0 : index
    %15 = vector.load %arg7[%c0_17, %c0_18] : memref<16x64xf32, #tpu.memory_space<vmem>>, vector<16x64xf32>
    %cst_19 = arith.constant 0.000000e+00 : f32
    %16 = vector.broadcast %cst_19 : f32 to vector<1x16xf32>
    %cst_20 = arith.constant 0.000000e+00 : f32
    %17 = vector.broadcast %cst_20 : f32 to vector<1x16xf32>
    %c0_i32 = arith.constant 0 : i32
    %c8_i32 = arith.constant 8 : i32
    %18 = arith.muli %c0_i32, %c8_i32 : i32
    %19 = tpu.assume_multiple %18, 8 : i32
    %20 = arith.index_cast %19 : i32 to index
    %c0_21 = arith.constant 0 : index
    %21 = vector.load %arg25[%20, %c0_21] : memref<8x64xf32, #tpu.memory_space<vmem>>, vector<8x64xf32>
    %22 = vector.extract_strided_slice %21 {offsets = [0, 0], sizes = [1, 64], strides = [1, 1]} : vector<8x64xf32> to vector<1x64xf32>
    %cst_22 = arith.constant dense<0.000000e+00> : vector<1x64xf32>
    %23 = tpu.matmul %16, %14, %cst_22 {dimension_numbers = #tpu.dot_dimension_numbers<[1], [0], [0], [1], [0, 0, 1, 1], [], []>} : vector<1x16xf32>, vector<16x64xf32>, vector<1x64xf32> -> vector<1x64xf32>
    %24 = arith.addf %22, %23 : vector<1x64xf32>
    %25 = vector.extract_strided_slice %24 {offsets = [0, 0], sizes = [1, 16], strides = [1, 1]} : vector<1x64xf32> to vector<1x16xf32>
    %26 = arith.negf %25 : vector<1x16xf32>
    %27 = math.exp %26 : vector<1x16xf32>
    %cst_23 = arith.constant 1.000000e+00 : f32
    %28 = vector.broadcast %cst_23 : f32 to vector<1x16xf32>
    %29 = arith.addf %28, %27 : vector<1x16xf32>
    %30 = arith.divf %28, %29 : vector<1x16xf32>
    %31 = vector.extract_strided_slice %24 {offsets = [0, 16], sizes = [1, 16], strides = [1, 1]} : vector<1x64xf32> to vector<1x16xf32>
    %32 = arith.negf %31 : vector<1x16xf32>
    %33 = math.exp %32 : vector<1x16xf32>
    %cst_24 = arith.constant 1.000000e+00 : f32
    %34 = vector.broadcast %cst_24 : f32 to vector<1x16xf32>
    %35 = arith.addf %34, %33 : vector<1x16xf32>
    %36 = arith.divf %34, %35 : vector<1x16xf32>
    %37 = vector.extract_strided_slice %24 {offsets = [0, 32], sizes = [1, 16], strides = [1, 1]} : vector<1x64xf32> to vector<1x16xf32>
    %38 = math.tanh %37 : vector<1x16xf32>
    %39 = vector.extract_strided_slice %24 {offsets = [0, 48], sizes = [1, 16], strides = [1, 1]} : vector<1x64xf32> to vector<1x16xf32>
    %40 = arith.negf %39 : vector<1x16xf32>
    %41 = math.exp %40 : vector<1x16xf32>
    %cst_25 = arith.constant 1.000000e+00 : f32
    %42 = vector.broadcast %cst_25 : f32 to vector<1x16xf32>
    %43 = arith.addf %42, %41 : vector<1x16xf32>
    %44 = arith.divf %42, %43 : vector<1x16xf32>
    %45 = arith.mulf %36, %17 : vector<1x16xf32>
    %46 = arith.mulf %30, %38 : vector<1x16xf32>
    %47 = arith.addf %45, %46 : vector<1x16xf32>
    %48 = math.tanh %47 : vector<1x16xf32>
    %49 = arith.mulf %44, %48 : vector<1x16xf32>
    %50 = vector.extract_strided_slice %21 {offsets = [1, 0], sizes = [1, 64], strides = [1, 1]} : vector<8x64xf32> to vector<1x64xf32>
    %cst_26 = arith.constant dense<0.000000e+00> : vector<1x64xf32>
    %51 = tpu.matmul %49, %14, %cst_26 {dimension_numbers = #tpu.dot_dimension_numbers<[1], [0], [0], [1], [0, 0, 1, 1], [], []>} : vector<1x16xf32>, vector<16x64xf32>, vector<1x64xf32> -> vector<1x64xf32>
    %52 = arith.addf %50, %51 : vector<1x64xf32>
    %53 = vector.extract_strided_slice %52 {offsets = [0, 0], sizes = [1, 16], strides = [1, 1]} : vector<1x64xf32> to vector<1x16xf32>
    %54 = arith.negf %53 : vector<1x16xf32>
    %55 = math.exp %54 : vector<1x16xf32>
    %cst_27 = arith.constant 1.000000e+00 : f32
    %56 = vector.broadcast %cst_27 : f32 to vector<1x16xf32>
    %57 = arith.addf %56, %55 : vector<1x16xf32>
    %58 = arith.divf %56, %57 : vector<1x16xf32>
    %59 = vector.extract_strided_slice %52 {offsets = [0, 16], sizes = [1, 16], strides = [1, 1]} : vector<1x64xf32> to vector<1x16xf32>
    %60 = arith.negf %59 : vector<1x16xf32>
    %61 = math.exp %60 : vector<1x16xf32>
    %cst_28 = arith.constant 1.000000e+00 : f32
    %62 = vector.broadcast %cst_28 : f32 to vector<1x16xf32>
    %63 = arith.addf %62, %61 : vector<1x16xf32>
    %64 = arith.divf %62, %63 : vector<1x16xf32>
    %65 = vector.extract_strided_slice %52 {offsets = [0, 32], sizes = [1, 16], strides = [1, 1]} : vector<1x64xf32> to vector<1x16xf32>
    %66 = math.tanh %65 : vector<1x16xf32>
    %67 = vector.extract_strided_slice %52 {offsets = [0, 48], sizes = [1, 16], strides = [1, 1]} : vector<1x64xf32> to vector<1x16xf32>
    %68 = arith.negf %67 : vector<1x16xf32>
    %69 = math.exp %68 : vector<1x16xf32>
    %cst_29 = arith.constant 1.000000e+00 : f32
    %70 = vector.broadcast %cst_29 : f32 to vector<1x16xf32>
    %71 = arith.addf %70, %69 : vector<1x16xf32>
    %72 = arith.divf %70, %71 : vector<1x16xf32>
    %73 = arith.mulf %64, %47 : vector<1x16xf32>
    %74 = arith.mulf %58, %66 : vector<1x16xf32>
    %75 = arith.addf %73, %74 : vector<1x16xf32>
    %76 = math.tanh %75 : vector<1x16xf32>
    %77 = arith.mulf %72, %76 : vector<1x16xf32>
    %78 = vector.extract_strided_slice %21 {offsets = [2, 0], sizes = [1, 64], strides = [1, 1]} : vector<8x64xf32> to vector<1x64xf32>
    %cst_30 = arith.constant dense<0.000000e+00> : vector<1x64xf32>
    %79 = tpu.matmul %77, %14, %cst_30 {dimension_numbers = #tpu.dot_dimension_numbers<[1], [0], [0], [1], [0, 0, 1, 1], [], []>} : vector<1x16xf32>, vector<16x64xf32>, vector<1x64xf32> -> vector<1x64xf32>
    %80 = arith.addf %78, %79 : vector<1x64xf32>
    %81 = vector.extract_strided_slice %80 {offsets = [0, 0], sizes = [1, 16], strides = [1, 1]} : vector<1x64xf32> to vector<1x16xf32>
    %82 = arith.negf %81 : vector<1x16xf32>
    %83 = math.exp %82 : vector<1x16xf32>
    %cst_31 = arith.constant 1.000000e+00 : f32
    %84 = vector.broadcast %cst_31 : f32 to vector<1x16xf32>
    %85 = arith.addf %84, %83 : vector<1x16xf32>
    %86 = arith.divf %84, %85 : vector<1x16xf32>
    %87 = vector.extract_strided_slice %80 {offsets = [0, 16], sizes = [1, 16], strides = [1, 1]} : vector<1x64xf32> to vector<1x16xf32>
    %88 = arith.negf %87 : vector<1x16xf32>
    %89 = math.exp %88 : vector<1x16xf32>
    %cst_32 = arith.constant 1.000000e+00 : f32
    %90 = vector.broadcast %cst_32 : f32 to vector<1x16xf32>
    %91 = arith.addf %90, %89 : vector<1x16xf32>
    %92 = arith.divf %90, %91 : vector<1x16xf32>
    %93 = vector.extract_strided_slice %80 {offsets = [0, 32], sizes = [1, 16], strides = [1, 1]} : vector<1x64xf32> to vector<1x16xf32>
    %94 = math.tanh %93 : vector<1x16xf32>
    %95 = vector.extract_strided_slice %80 {offsets = [0, 48], sizes = [1, 16], strides = [1, 1]} : vector<1x64xf32> to vector<1x16xf32>
    %96 = arith.negf %95 : vector<1x16xf32>
    %97 = math.exp %96 : vector<1x16xf32>
    %cst_33 = arith.constant 1.000000e+00 : f32
    %98 = vector.broadcast %cst_33 : f32 to vector<1x16xf32>
    %99 = arith.addf %98, %97 : vector<1x16xf32>
    %100 = arith.divf %98, %99 : vector<1x16xf32>
    %101 = arith.mulf %92, %75 : vector<1x16xf32>
    %102 = arith.mulf %86, %94 : vector<1x16xf32>
    %103 = arith.addf %101, %102 : vector<1x16xf32>
    %104 = math.tanh %103 : vector<1x16xf32>
    %105 = arith.mulf %100, %104 : vector<1x16xf32>
    %106 = vector.extract_strided_slice %21 {offsets = [3, 0], sizes = [1, 64], strides = [1, 1]} : vector<8x64xf32> to vector<1x64xf32>
    %cst_34 = arith.constant dense<0.000000e+00> : vector<1x64xf32>
    %107 = tpu.matmul %105, %14, %cst_34 {dimension_numbers = #tpu.dot_dimension_numbers<[1], [0], [0], [1], [0, 0, 1, 1], [], []>} : vector<1x16xf32>, vector<16x64xf32>, vector<1x64xf32> -> vector<1x64xf32>
    %108 = arith.addf %106, %107 : vector<1x64xf32>
    %109 = vector.extract_strided_slice %108 {offsets = [0, 0], sizes = [1, 16], strides = [1, 1]} : vector<1x64xf32> to vector<1x16xf32>
    %110 = arith.negf %109 : vector<1x16xf32>
    %111 = math.exp %110 : vector<1x16xf32>
    %cst_35 = arith.constant 1.000000e+00 : f32
    %112 = vector.broadcast %cst_35 : f32 to vector<1x16xf32>
    %113 = arith.addf %112, %111 : vector<1x16xf32>
    %114 = arith.divf %112, %113 : vector<1x16xf32>
    %115 = vector.extract_strided_slice %108 {offsets = [0, 16], sizes = [1, 16], strides = [1, 1]} : vector<1x64xf32> to vector<1x16xf32>
    %116 = arith.negf %115 : vector<1x16xf32>
    %117 = math.exp %116 : vector<1x16xf32>
    %cst_36 = arith.constant 1.000000e+00 : f32
    %118 = vector.broadcast %cst_36 : f32 to vector<1x16xf32>
    %119 = arith.addf %118, %117 : vector<1x16xf32>
    %120 = arith.divf %118, %119 : vector<1x16xf32>
    %121 = vector.extract_strided_slice %108 {offsets = [0, 32], sizes = [1, 16], strides = [1, 1]} : vector<1x64xf32> to vector<1x16xf32>
    %122 = math.tanh %121 : vector<1x16xf32>
    %123 = vector.extract_strided_slice %108 {offsets = [0, 48], sizes = [1, 16], strides = [1, 1]} : vector<1x64xf32> to vector<1x16xf32>
    %124 = arith.negf %123 : vector<1x16xf32>
    %125 = math.exp %124 : vector<1x16xf32>
    %cst_37 = arith.constant 1.000000e+00 : f32
    %126 = vector.broadcast %cst_37 : f32 to vector<1x16xf32>
    %127 = arith.addf %126, %125 : vector<1x16xf32>
    %128 = arith.divf %126, %127 : vector<1x16xf32>
    %129 = arith.mulf %120, %103 : vector<1x16xf32>
    %130 = arith.mulf %114, %122 : vector<1x16xf32>
    %131 = arith.addf %129, %130 : vector<1x16xf32>
    %132 = math.tanh %131 : vector<1x16xf32>
    %133 = arith.mulf %128, %132 : vector<1x16xf32>
    %134 = vector.extract_strided_slice %21 {offsets = [4, 0], sizes = [1, 64], strides = [1, 1]} : vector<8x64xf32> to vector<1x64xf32>
    %cst_38 = arith.constant dense<0.000000e+00> : vector<1x64xf32>
    %135 = tpu.matmul %133, %14, %cst_38 {dimension_numbers = #tpu.dot_dimension_numbers<[1], [0], [0], [1], [0, 0, 1, 1], [], []>} : vector<1x16xf32>, vector<16x64xf32>, vector<1x64xf32> -> vector<1x64xf32>
    %136 = arith.addf %134, %135 : vector<1x64xf32>
    %137 = vector.extract_strided_slice %136 {offsets = [0, 0], sizes = [1, 16], strides = [1, 1]} : vector<1x64xf32> to vector<1x16xf32>
    %138 = arith.negf %137 : vector<1x16xf32>
    %139 = math.exp %138 : vector<1x16xf32>
    %cst_39 = arith.constant 1.000000e+00 : f32
    %140 = vector.broadcast %cst_39 : f32 to vector<1x16xf32>
    %141 = arith.addf %140, %139 : vector<1x16xf32>
    %142 = arith.divf %140, %141 : vector<1x16xf32>
    %143 = vector.extract_strided_slice %136 {offsets = [0, 16], sizes = [1, 16], strides = [1, 1]} : vector<1x64xf32> to vector<1x16xf32>
    %144 = arith.negf %143 : vector<1x16xf32>
    %145 = math.exp %144 : vector<1x16xf32>
    %cst_40 = arith.constant 1.000000e+00 : f32
    %146 = vector.broadcast %cst_40 : f32 to vector<1x16xf32>
    %147 = arith.addf %146, %145 : vector<1x16xf32>
    %148 = arith.divf %146, %147 : vector<1x16xf32>
    %149 = vector.extract_strided_slice %136 {offsets = [0, 32], sizes = [1, 16], strides = [1, 1]} : vector<1x64xf32> to vector<1x16xf32>
    %150 = math.tanh %149 : vector<1x16xf32>
    %151 = vector.extract_strided_slice %136 {offsets = [0, 48], sizes = [1, 16], strides = [1, 1]} : vector<1x64xf32> to vector<1x16xf32>
    %152 = arith.negf %151 : vector<1x16xf32>
    %153 = math.exp %152 : vector<1x16xf32>
    %cst_41 = arith.constant 1.000000e+00 : f32
    %154 = vector.broadcast %cst_41 : f32 to vector<1x16xf32>
    %155 = arith.addf %154, %153 : vector<1x16xf32>
    %156 = arith.divf %154, %155 : vector<1x16xf32>
    %157 = arith.mulf %148, %131 : vector<1x16xf32>
    %158 = arith.mulf %142, %150 : vector<1x16xf32>
    %159 = arith.addf %157, %158 : vector<1x16xf32>
    %160 = math.tanh %159 : vector<1x16xf32>
    %161 = arith.mulf %156, %160 : vector<1x16xf32>
    %162 = vector.extract_strided_slice %21 {offsets = [5, 0], sizes = [1, 64], strides = [1, 1]} : vector<8x64xf32> to vector<1x64xf32>
    %cst_42 = arith.constant dense<0.000000e+00> : vector<1x64xf32>
    %163 = tpu.matmul %161, %14, %cst_42 {dimension_numbers = #tpu.dot_dimension_numbers<[1], [0], [0], [1], [0, 0, 1, 1], [], []>} : vector<1x16xf32>, vector<16x64xf32>, vector<1x64xf32> -> vector<1x64xf32>
    %164 = arith.addf %162, %163 : vector<1x64xf32>
    %165 = vector.extract_strided_slice %164 {offsets = [0, 0], sizes = [1, 16], strides = [1, 1]} : vector<1x64xf32> to vector<1x16xf32>
    %166 = arith.negf %165 : vector<1x16xf32>
    %167 = math.exp %166 : vector<1x16xf32>
    %cst_43 = arith.constant 1.000000e+00 : f32
    %168 = vector.broadcast %cst_43 : f32 to vector<1x16xf32>
    %169 = arith.addf %168, %167 : vector<1x16xf32>
    %170 = arith.divf %168, %169 : vector<1x16xf32>
    %171 = vector.extract_strided_slice %164 {offsets = [0, 16], sizes = [1, 16], strides = [1, 1]} : vector<1x64xf32> to vector<1x16xf32>
    %172 = arith.negf %171 : vector<1x16xf32>
    %173 = math.exp %172 : vector<1x16xf32>
    %cst_44 = arith.constant 1.000000e+00 : f32
    %174 = vector.broadcast %cst_44 : f32 to vector<1x16xf32>
    %175 = arith.addf %174, %173 : vector<1x16xf32>
    %176 = arith.divf %174, %175 : vector<1x16xf32>
    %177 = vector.extract_strided_slice %164 {offsets = [0, 32], sizes = [1, 16], strides = [1, 1]} : vector<1x64xf32> to vector<1x16xf32>
    %178 = math.tanh %177 : vector<1x16xf32>
    %179 = vector.extract_strided_slice %164 {offsets = [0, 48], sizes = [1, 16], strides = [1, 1]} : vector<1x64xf32> to vector<1x16xf32>
    %180 = arith.negf %179 : vector<1x16xf32>
    %181 = math.exp %180 : vector<1x16xf32>
    %cst_45 = arith.constant 1.000000e+00 : f32
    %182 = vector.broadcast %cst_45 : f32 to vector<1x16xf32>
    %183 = arith.addf %182, %181 : vector<1x16xf32>
    %184 = arith.divf %182, %183 : vector<1x16xf32>
    %185 = arith.mulf %176, %159 : vector<1x16xf32>
    %186 = arith.mulf %170, %178 : vector<1x16xf32>
    %187 = arith.addf %185, %186 : vector<1x16xf32>
    %188 = math.tanh %187 : vector<1x16xf32>
    %189 = arith.mulf %184, %188 : vector<1x16xf32>
    %190 = vector.extract_strided_slice %21 {offsets = [6, 0], sizes = [1, 64], strides = [1, 1]} : vector<8x64xf32> to vector<1x64xf32>
    %cst_46 = arith.constant dense<0.000000e+00> : vector<1x64xf32>
    %191 = tpu.matmul %189, %14, %cst_46 {dimension_numbers = #tpu.dot_dimension_numbers<[1], [0], [0], [1], [0, 0, 1, 1], [], []>} : vector<1x16xf32>, vector<16x64xf32>, vector<1x64xf32> -> vector<1x64xf32>
    %192 = arith.addf %190, %191 : vector<1x64xf32>
    %193 = vector.extract_strided_slice %192 {offsets = [0, 0], sizes = [1, 16], strides = [1, 1]} : vector<1x64xf32> to vector<1x16xf32>
    %194 = arith.negf %193 : vector<1x16xf32>
    %195 = math.exp %194 : vector<1x16xf32>
    %cst_47 = arith.constant 1.000000e+00 : f32
    %196 = vector.broadcast %cst_47 : f32 to vector<1x16xf32>
    %197 = arith.addf %196, %195 : vector<1x16xf32>
    %198 = arith.divf %196, %197 : vector<1x16xf32>
    %199 = vector.extract_strided_slice %192 {offsets = [0, 16], sizes = [1, 16], strides = [1, 1]} : vector<1x64xf32> to vector<1x16xf32>
    %200 = arith.negf %199 : vector<1x16xf32>
    %201 = math.exp %200 : vector<1x16xf32>
    %cst_48 = arith.constant 1.000000e+00 : f32
    %202 = vector.broadcast %cst_48 : f32 to vector<1x16xf32>
    %203 = arith.addf %202, %201 : vector<1x16xf32>
    %204 = arith.divf %202, %203 : vector<1x16xf32>
    %205 = vector.extract_strided_slice %192 {offsets = [0, 32], sizes = [1, 16], strides = [1, 1]} : vector<1x64xf32> to vector<1x16xf32>
    %206 = math.tanh %205 : vector<1x16xf32>
    %207 = vector.extract_strided_slice %192 {offsets = [0, 48], sizes = [1, 16], strides = [1, 1]} : vector<1x64xf32> to vector<1x16xf32>
    %208 = arith.negf %207 : vector<1x16xf32>
    %209 = math.exp %208 : vector<1x16xf32>
    %cst_49 = arith.constant 1.000000e+00 : f32
    %210 = vector.broadcast %cst_49 : f32 to vector<1x16xf32>
    %211 = arith.addf %210, %209 : vector<1x16xf32>
    %212 = arith.divf %210, %211 : vector<1x16xf32>
    %213 = arith.mulf %204, %187 : vector<1x16xf32>
    %214 = arith.mulf %198, %206 : vector<1x16xf32>
    %215 = arith.addf %213, %214 : vector<1x16xf32>
    %216 = math.tanh %215 : vector<1x16xf32>
    %217 = arith.mulf %212, %216 : vector<1x16xf32>
    %218 = vector.extract_strided_slice %21 {offsets = [7, 0], sizes = [1, 64], strides = [1, 1]} : vector<8x64xf32> to vector<1x64xf32>
    %cst_50 = arith.constant dense<0.000000e+00> : vector<1x64xf32>
    %219 = tpu.matmul %217, %14, %cst_50 {dimension_numbers = #tpu.dot_dimension_numbers<[1], [0], [0], [1], [0, 0, 1, 1], [], []>} : vector<1x16xf32>, vector<16x64xf32>, vector<1x64xf32> -> vector<1x64xf32>
    %220 = arith.addf %218, %219 : vector<1x64xf32>
    %221 = vector.extract_strided_slice %220 {offsets = [0, 0], sizes = [1, 16], strides = [1, 1]} : vector<1x64xf32> to vector<1x16xf32>
    %222 = arith.negf %221 : vector<1x16xf32>
    %223 = math.exp %222 : vector<1x16xf32>
    %cst_51 = arith.constant 1.000000e+00 : f32
    %224 = vector.broadcast %cst_51 : f32 to vector<1x16xf32>
    %225 = arith.addf %224, %223 : vector<1x16xf32>
    %226 = arith.divf %224, %225 : vector<1x16xf32>
    %227 = vector.extract_strided_slice %220 {offsets = [0, 16], sizes = [1, 16], strides = [1, 1]} : vector<1x64xf32> to vector<1x16xf32>
    %228 = arith.negf %227 : vector<1x16xf32>
    %229 = math.exp %228 : vector<1x16xf32>
    %cst_52 = arith.constant 1.000000e+00 : f32
    %230 = vector.broadcast %cst_52 : f32 to vector<1x16xf32>
    %231 = arith.addf %230, %229 : vector<1x16xf32>
    %232 = arith.divf %230, %231 : vector<1x16xf32>
    %233 = vector.extract_strided_slice %220 {offsets = [0, 32], sizes = [1, 16], strides = [1, 1]} : vector<1x64xf32> to vector<1x16xf32>
    %234 = math.tanh %233 : vector<1x16xf32>
    %235 = vector.extract_strided_slice %220 {offsets = [0, 48], sizes = [1, 16], strides = [1, 1]} : vector<1x64xf32> to vector<1x16xf32>
    %236 = arith.negf %235 : vector<1x16xf32>
    %237 = math.exp %236 : vector<1x16xf32>
    %cst_53 = arith.constant 1.000000e+00 : f32
    %238 = vector.broadcast %cst_53 : f32 to vector<1x16xf32>
    %239 = arith.addf %238, %237 : vector<1x16xf32>
    %240 = arith.divf %238, %239 : vector<1x16xf32>
    %241 = arith.mulf %232, %215 : vector<1x16xf32>
    %242 = arith.mulf %226, %234 : vector<1x16xf32>
    %243 = arith.addf %241, %242 : vector<1x16xf32>
    %244 = math.tanh %243 : vector<1x16xf32>
    %245 = arith.mulf %240, %244 : vector<1x16xf32>
    %246 = tpu.concatenate %49, %77, %105, %133, %161, %189, %217, %245 in 0 : vector<1x16xf32>, vector<1x16xf32>, vector<1x16xf32>, vector<1x16xf32>, vector<1x16xf32>, vector<1x16xf32>, vector<1x16xf32>, vector<1x16xf32> -> vector<8x16xf32>
    %247 = arith.index_cast %19 : i32 to index
    %c0_54 = arith.constant 0 : index
    %248 = vector.load %arg27[%247, %c0_54] : memref<8x32xf32, #tpu.memory_space<vmem>>, vector<8x16xf32>
    tpu.vector_store %arg27[%247, %c0_54], %246 {strides = array<i32>} : memref<8x32xf32, #tpu.memory_space<vmem>>, vector<8x16xf32>,
    %c1_i32 = arith.constant 1 : i32
    %c0_i32_55 = arith.constant 0 : i32
    %c1_i32_56 = arith.constant 1 : i32
    %249 = arith.addi %c0_i32_55, %c1_i32_56 : i32
    %c8_i32_57 = arith.constant 8 : i32
    %250 = arith.muli %249, %c8_i32_57 : i32
    %c8_i32_58 = arith.constant 8 : i32
    %251 = arith.subi %c8_i32_58, %250 : i32
    %252 = tpu.assume_multiple %251, 8 : i32
    %253 = arith.index_cast %252 : i32 to index
    %c0_59 = arith.constant 0 : index
    %254 = vector.load %arg26[%253, %c0_59] : memref<8x64xf32, #tpu.memory_space<vmem>>, vector<8x64xf32>
    %255 = vector.extract_strided_slice %254 {offsets = [7, 0], sizes = [1, 64], strides = [1, 1]} : vector<8x64xf32> to vector<1x64xf32>
    %cst_60 = arith.constant dense<0.000000e+00> : vector<1x64xf32>
    %256 = tpu.matmul %16, %15, %cst_60 {dimension_numbers = #tpu.dot_dimension_numbers<[1], [0], [0], [1], [0, 0, 1, 1], [], []>} : vector<1x16xf32>, vector<16x64xf32>, vector<1x64xf32> -> vector<1x64xf32>
    %257 = arith.addf %255, %256 : vector<1x64xf32>
    %258 = vector.extract_strided_slice %257 {offsets = [0, 0], sizes = [1, 16], strides = [1, 1]} : vector<1x64xf32> to vector<1x16xf32>
    %259 = arith.negf %258 : vector<1x16xf32>
    %260 = math.exp %259 : vector<1x16xf32>
    %cst_61 = arith.constant 1.000000e+00 : f32
    %261 = vector.broadcast %cst_61 : f32 to vector<1x16xf32>
    %262 = arith.addf %261, %260 : vector<1x16xf32>
    %263 = arith.divf %261, %262 : vector<1x16xf32>
    %264 = vector.extract_strided_slice %257 {offsets = [0, 16], sizes = [1, 16], strides = [1, 1]} : vector<1x64xf32> to vector<1x16xf32>
    %265 = arith.negf %264 : vector<1x16xf32>
    %266 = math.exp %265 : vector<1x16xf32>
    %cst_62 = arith.constant 1.000000e+00 : f32
    %267 = vector.broadcast %cst_62 : f32 to vector<1x16xf32>
    %268 = arith.addf %267, %266 : vector<1x16xf32>
    %269 = arith.divf %267, %268 : vector<1x16xf32>
    %270 = vector.extract_strided_slice %257 {offsets = [0, 32], sizes = [1, 16], strides = [1, 1]} : vector<1x64xf32> to vector<1x16xf32>
    %271 = math.tanh %270 : vector<1x16xf32>
    %272 = vector.extract_strided_slice %257 {offsets = [0, 48], sizes = [1, 16], strides = [1, 1]} : vector<1x64xf32> to vector<1x16xf32>
    %273 = arith.negf %272 : vector<1x16xf32>
    %274 = math.exp %273 : vector<1x16xf32>
    %cst_63 = arith.constant 1.000000e+00 : f32
    %275 = vector.broadcast %cst_63 : f32 to vector<1x16xf32>
    %276 = arith.addf %275, %274 : vector<1x16xf32>
    %277 = arith.divf %275, %276 : vector<1x16xf32>
    %278 = arith.mulf %269, %17 : vector<1x16xf32>
    %279 = arith.mulf %263, %271 : vector<1x16xf32>
    %280 = arith.addf %278, %279 : vector<1x16xf32>
    %281 = math.tanh %280 : vector<1x16xf32>
    %282 = arith.mulf %277, %281 : vector<1x16xf32>
    %283 = vector.extract_strided_slice %254 {offsets = [6, 0], sizes = [1, 64], strides = [1, 1]} : vector<8x64xf32> to vector<1x64xf32>
    %cst_64 = arith.constant dense<0.000000e+00> : vector<1x64xf32>
    %284 = tpu.matmul %282, %15, %cst_64 {dimension_numbers = #tpu.dot_dimension_numbers<[1], [0], [0], [1], [0, 0, 1, 1], [], []>} : vector<1x16xf32>, vector<16x64xf32>, vector<1x64xf32> -> vector<1x64xf32>
    %285 = arith.addf %283, %284 : vector<1x64xf32>
    %286 = vector.extract_strided_slice %285 {offsets = [0, 0], sizes = [1, 16], strides = [1, 1]} : vector<1x64xf32> to vector<1x16xf32>
    %287 = arith.negf %286 : vector<1x16xf32>
    %288 = math.exp %287 : vector<1x16xf32>
    %cst_65 = arith.constant 1.000000e+00 : f32
    %289 = vector.broadcast %cst_65 : f32 to vector<1x16xf32>
    %290 = arith.addf %289, %288 : vector<1x16xf32>
    %291 = arith.divf %289, %290 : vector<1x16xf32>
    %292 = vector.extract_strided_slice %285 {offsets = [0, 16], sizes = [1, 16], strides = [1, 1]} : vector<1x64xf32> to vector<1x16xf32>
    %293 = arith.negf %292 : vector<1x16xf32>
    %294 = math.exp %293 : vector<1x16xf32>
    %cst_66 = arith.constant 1.000000e+00 : f32
    %295 = vector.broadcast %cst_66 : f32 to vector<1x16xf32>
    %296 = arith.addf %295, %294 : vector<1x16xf32>
    %297 = arith.divf %295, %296 : vector<1x16xf32>
    %298 = vector.extract_strided_slice %285 {offsets = [0, 32], sizes = [1, 16], strides = [1, 1]} : vector<1x64xf32> to vector<1x16xf32>
    %299 = math.tanh %298 : vector<1x16xf32>
    %300 = vector.extract_strided_slice %285 {offsets = [0, 48], sizes = [1, 16], strides = [1, 1]} : vector<1x64xf32> to vector<1x16xf32>
    %301 = arith.negf %300 : vector<1x16xf32>
    %302 = math.exp %301 : vector<1x16xf32>
    %cst_67 = arith.constant 1.000000e+00 : f32
    %303 = vector.broadcast %cst_67 : f32 to vector<1x16xf32>
    %304 = arith.addf %303, %302 : vector<1x16xf32>
    %305 = arith.divf %303, %304 : vector<1x16xf32>
    %306 = arith.mulf %297, %280 : vector<1x16xf32>
    %307 = arith.mulf %291, %299 : vector<1x16xf32>
    %308 = arith.addf %306, %307 : vector<1x16xf32>
    %309 = math.tanh %308 : vector<1x16xf32>
    %310 = arith.mulf %305, %309 : vector<1x16xf32>
    %311 = vector.extract_strided_slice %254 {offsets = [5, 0], sizes = [1, 64], strides = [1, 1]} : vector<8x64xf32> to vector<1x64xf32>
    %cst_68 = arith.constant dense<0.000000e+00> : vector<1x64xf32>
    %312 = tpu.matmul %310, %15, %cst_68 {dimension_numbers = #tpu.dot_dimension_numbers<[1], [0], [0], [1], [0, 0, 1, 1], [], []>} : vector<1x16xf32>, vector<16x64xf32>, vector<1x64xf32> -> vector<1x64xf32>
    %313 = arith.addf %311, %312 : vector<1x64xf32>
    %314 = vector.extract_strided_slice %313 {offsets = [0, 0], sizes = [1, 16], strides = [1, 1]} : vector<1x64xf32> to vector<1x16xf32>
    %315 = arith.negf %314 : vector<1x16xf32>
    %316 = math.exp %315 : vector<1x16xf32>
    %cst_69 = arith.constant 1.000000e+00 : f32
    %317 = vector.broadcast %cst_69 : f32 to vector<1x16xf32>
    %318 = arith.addf %317, %316 : vector<1x16xf32>
    %319 = arith.divf %317, %318 : vector<1x16xf32>
    %320 = vector.extract_strided_slice %313 {offsets = [0, 16], sizes = [1, 16], strides = [1, 1]} : vector<1x64xf32> to vector<1x16xf32>
    %321 = arith.negf %320 : vector<1x16xf32>
    %322 = math.exp %321 : vector<1x16xf32>
    %cst_70 = arith.constant 1.000000e+00 : f32
    %323 = vector.broadcast %cst_70 : f32 to vector<1x16xf32>
    %324 = arith.addf %323, %322 : vector<1x16xf32>
    %325 = arith.divf %323, %324 : vector<1x16xf32>
    %326 = vector.extract_strided_slice %313 {offsets = [0, 32], sizes = [1, 16], strides = [1, 1]} : vector<1x64xf32> to vector<1x16xf32>
    %327 = math.tanh %326 : vector<1x16xf32>
    %328 = vector.extract_strided_slice %313 {offsets = [0, 48], sizes = [1, 16], strides = [1, 1]} : vector<1x64xf32> to vector<1x16xf32>
    %329 = arith.negf %328 : vector<1x16xf32>
    %330 = math.exp %329 : vector<1x16xf32>
    %cst_71 = arith.constant 1.000000e+00 : f32
    %331 = vector.broadcast %cst_71 : f32 to vector<1x16xf32>
    %332 = arith.addf %331, %330 : vector<1x16xf32>
    %333 = arith.divf %331, %332 : vector<1x16xf32>
    %334 = arith.mulf %325, %308 : vector<1x16xf32>
    %335 = arith.mulf %319, %327 : vector<1x16xf32>
    %336 = arith.addf %334, %335 : vector<1x16xf32>
    %337 = math.tanh %336 : vector<1x16xf32>
    %338 = arith.mulf %333, %337 : vector<1x16xf32>
    %339 = vector.extract_strided_slice %254 {offsets = [4, 0], sizes = [1, 64], strides = [1, 1]} : vector<8x64xf32> to vector<1x64xf32>
    %cst_72 = arith.constant dense<0.000000e+00> : vector<1x64xf32>
    %340 = tpu.matmul %338, %15, %cst_72 {dimension_numbers = #tpu.dot_dimension_numbers<[1], [0], [0], [1], [0, 0, 1, 1], [], []>} : vector<1x16xf32>, vector<16x64xf32>, vector<1x64xf32> -> vector<1x64xf32>
    %341 = arith.addf %339, %340 : vector<1x64xf32>
    %342 = vector.extract_strided_slice %341 {offsets = [0, 0], sizes = [1, 16], strides = [1, 1]} : vector<1x64xf32> to vector<1x16xf32>
    %343 = arith.negf %342 : vector<1x16xf32>
    %344 = math.exp %343 : vector<1x16xf32>
    %cst_73 = arith.constant 1.000000e+00 : f32
    %345 = vector.broadcast %cst_73 : f32 to vector<1x16xf32>
    %346 = arith.addf %345, %344 : vector<1x16xf32>
    %347 = arith.divf %345, %346 : vector<1x16xf32>
    %348 = vector.extract_strided_slice %341 {offsets = [0, 16], sizes = [1, 16], strides = [1, 1]} : vector<1x64xf32> to vector<1x16xf32>
    %349 = arith.negf %348 : vector<1x16xf32>
    %350 = math.exp %349 : vector<1x16xf32>
    %cst_74 = arith.constant 1.000000e+00 : f32
    %351 = vector.broadcast %cst_74 : f32 to vector<1x16xf32>
    %352 = arith.addf %351, %350 : vector<1x16xf32>
    %353 = arith.divf %351, %352 : vector<1x16xf32>
    %354 = vector.extract_strided_slice %341 {offsets = [0, 32], sizes = [1, 16], strides = [1, 1]} : vector<1x64xf32> to vector<1x16xf32>
    %355 = math.tanh %354 : vector<1x16xf32>
    %356 = vector.extract_strided_slice %341 {offsets = [0, 48], sizes = [1, 16], strides = [1, 1]} : vector<1x64xf32> to vector<1x16xf32>
    %357 = arith.negf %356 : vector<1x16xf32>
    %358 = math.exp %357 : vector<1x16xf32>
    %cst_75 = arith.constant 1.000000e+00 : f32
    %359 = vector.broadcast %cst_75 : f32 to vector<1x16xf32>
    %360 = arith.addf %359, %358 : vector<1x16xf32>
    %361 = arith.divf %359, %360 : vector<1x16xf32>
    %362 = arith.mulf %353, %336 : vector<1x16xf32>
    %363 = arith.mulf %347, %355 : vector<1x16xf32>
    %364 = arith.addf %362, %363 : vector<1x16xf32>
    %365 = math.tanh %364 : vector<1x16xf32>
    %366 = arith.mulf %361, %365 : vector<1x16xf32>
    %367 = vector.extract_strided_slice %254 {offsets = [3, 0], sizes = [1, 64], strides = [1, 1]} : vector<8x64xf32> to vector<1x64xf32>
    %cst_76 = arith.constant dense<0.000000e+00> : vector<1x64xf32>
    %368 = tpu.matmul %366, %15, %cst_76 {dimension_numbers = #tpu.dot_dimension_numbers<[1], [0], [0], [1], [0, 0, 1, 1], [], []>} : vector<1x16xf32>, vector<16x64xf32>, vector<1x64xf32> -> vector<1x64xf32>
    %369 = arith.addf %367, %368 : vector<1x64xf32>
    %370 = vector.extract_strided_slice %369 {offsets = [0, 0], sizes = [1, 16], strides = [1, 1]} : vector<1x64xf32> to vector<1x16xf32>
    %371 = arith.negf %370 : vector<1x16xf32>
    %372 = math.exp %371 : vector<1x16xf32>
    %cst_77 = arith.constant 1.000000e+00 : f32
    %373 = vector.broadcast %cst_77 : f32 to vector<1x16xf32>
    %374 = arith.addf %373, %372 : vector<1x16xf32>
    %375 = arith.divf %373, %374 : vector<1x16xf32>
    %376 = vector.extract_strided_slice %369 {offsets = [0, 16], sizes = [1, 16], strides = [1, 1]} : vector<1x64xf32> to vector<1x16xf32>
    %377 = arith.negf %376 : vector<1x16xf32>
    %378 = math.exp %377 : vector<1x16xf32>
    %cst_78 = arith.constant 1.000000e+00 : f32
    %379 = vector.broadcast %cst_78 : f32 to vector<1x16xf32>
    %380 = arith.addf %379, %378 : vector<1x16xf32>
    %381 = arith.divf %379, %380 : vector<1x16xf32>
    %382 = vector.extract_strided_slice %369 {offsets = [0, 32], sizes = [1, 16], strides = [1, 1]} : vector<1x64xf32> to vector<1x16xf32>
    %383 = math.tanh %382 : vector<1x16xf32>
    %384 = vector.extract_strided_slice %369 {offsets = [0, 48], sizes = [1, 16], strides = [1, 1]} : vector<1x64xf32> to vector<1x16xf32>
    %385 = arith.negf %384 : vector<1x16xf32>
    %386 = math.exp %385 : vector<1x16xf32>
    %cst_79 = arith.constant 1.000000e+00 : f32
    %387 = vector.broadcast %cst_79 : f32 to vector<1x16xf32>
    %388 = arith.addf %387, %386 : vector<1x16xf32>
    %389 = arith.divf %387, %388 : vector<1x16xf32>
    %390 = arith.mulf %381, %364 : vector<1x16xf32>
    %391 = arith.mulf %375, %383 : vector<1x16xf32>
    %392 = arith.addf %390, %391 : vector<1x16xf32>
    %393 = math.tanh %392 : vector<1x16xf32>
    %394 = arith.mulf %389, %393 : vector<1x16xf32>
    %395 = vector.extract_strided_slice %254 {offsets = [2, 0], sizes = [1, 64], strides = [1, 1]} : vector<8x64xf32> to vector<1x64xf32>
    %cst_80 = arith.constant dense<0.000000e+00> : vector<1x64xf32>
    %396 = tpu.matmul %394, %15, %cst_80 {dimension_numbers = #tpu.dot_dimension_numbers<[1], [0], [0], [1], [0, 0, 1, 1], [], []>} : vector<1x16xf32>, vector<16x64xf32>, vector<1x64xf32> -> vector<1x64xf32>
    %397 = arith.addf %395, %396 : vector<1x64xf32>
    %398 = vector.extract_strided_slice %397 {offsets = [0, 0], sizes = [1, 16], strides = [1, 1]} : vector<1x64xf32> to vector<1x16xf32>
    %399 = arith.negf %398 : vector<1x16xf32>
    %400 = math.exp %399 : vector<1x16xf32>
    %cst_81 = arith.constant 1.000000e+00 : f32
    %401 = vector.broadcast %cst_81 : f32 to vector<1x16xf32>
    %402 = arith.addf %401, %400 : vector<1x16xf32>
    %403 = arith.divf %401, %402 : vector<1x16xf32>
    %404 = vector.extract_strided_slice %397 {offsets = [0, 16], sizes = [1, 16], strides = [1, 1]} : vector<1x64xf32> to vector<1x16xf32>
    %405 = arith.negf %404 : vector<1x16xf32>
    %406 = math.exp %405 : vector<1x16xf32>
    %cst_82 = arith.constant 1.000000e+00 : f32
    %407 = vector.broadcast %cst_82 : f32 to vector<1x16xf32>
    %408 = arith.addf %407, %406 : vector<1x16xf32>
    %409 = arith.divf %407, %408 : vector<1x16xf32>
    %410 = vector.extract_strided_slice %397 {offsets = [0, 32], sizes = [1, 16], strides = [1, 1]} : vector<1x64xf32> to vector<1x16xf32>
    %411 = math.tanh %410 : vector<1x16xf32>
    %412 = vector.extract_strided_slice %397 {offsets = [0, 48], sizes = [1, 16], strides = [1, 1]} : vector<1x64xf32> to vector<1x16xf32>
    %413 = arith.negf %412 : vector<1x16xf32>
    %414 = math.exp %413 : vector<1x16xf32>
    %cst_83 = arith.constant 1.000000e+00 : f32
    %415 = vector.broadcast %cst_83 : f32 to vector<1x16xf32>
    %416 = arith.addf %415, %414 : vector<1x16xf32>
    %417 = arith.divf %415, %416 : vector<1x16xf32>
    %418 = arith.mulf %409, %392 : vector<1x16xf32>
    %419 = arith.mulf %403, %411 : vector<1x16xf32>
    %420 = arith.addf %418, %419 : vector<1x16xf32>
    %421 = math.tanh %420 : vector<1x16xf32>
    %422 = arith.mulf %417, %421 : vector<1x16xf32>
    %423 = vector.extract_strided_slice %254 {offsets = [1, 0], sizes = [1, 64], strides = [1, 1]} : vector<8x64xf32> to vector<1x64xf32>
    %cst_84 = arith.constant dense<0.000000e+00> : vector<1x64xf32>
    %424 = tpu.matmul %422, %15, %cst_84 {dimension_numbers = #tpu.dot_dimension_numbers<[1], [0], [0], [1], [0, 0, 1, 1], [], []>} : vector<1x16xf32>, vector<16x64xf32>, vector<1x64xf32> -> vector<1x64xf32>
    %425 = arith.addf %423, %424 : vector<1x64xf32>
    %426 = vector.extract_strided_slice %425 {offsets = [0, 0], sizes = [1, 16], strides = [1, 1]} : vector<1x64xf32> to vector<1x16xf32>
    %427 = arith.negf %426 : vector<1x16xf32>
    %428 = math.exp %427 : vector<1x16xf32>
    %cst_85 = arith.constant 1.000000e+00 : f32
    %429 = vector.broadcast %cst_85 : f32 to vector<1x16xf32>
    %430 = arith.addf %429, %428 : vector<1x16xf32>
    %431 = arith.divf %429, %430 : vector<1x16xf32>
    %432 = vector.extract_strided_slice %425 {offsets = [0, 16], sizes = [1, 16], strides = [1, 1]} : vector<1x64xf32> to vector<1x16xf32>
    %433 = arith.negf %432 : vector<1x16xf32>
    %434 = math.exp %433 : vector<1x16xf32>
    %cst_86 = arith.constant 1.000000e+00 : f32
    %435 = vector.broadcast %cst_86 : f32 to vector<1x16xf32>
    %436 = arith.addf %435, %434 : vector<1x16xf32>
    %437 = arith.divf %435, %436 : vector<1x16xf32>
    %438 = vector.extract_strided_slice %425 {offsets = [0, 32], sizes = [1, 16], strides = [1, 1]} : vector<1x64xf32> to vector<1x16xf32>
    %439 = math.tanh %438 : vector<1x16xf32>
    %440 = vector.extract_strided_slice %425 {offsets = [0, 48], sizes = [1, 16], strides = [1, 1]} : vector<1x64xf32> to vector<1x16xf32>
    %441 = arith.negf %440 : vector<1x16xf32>
    %442 = math.exp %441 : vector<1x16xf32>
    %cst_87 = arith.constant 1.000000e+00 : f32
    %443 = vector.broadcast %cst_87 : f32 to vector<1x16xf32>
    %444 = arith.addf %443, %442 : vector<1x16xf32>
    %445 = arith.divf %443, %444 : vector<1x16xf32>
    %446 = arith.mulf %437, %420 : vector<1x16xf32>
    %447 = arith.mulf %431, %439 : vector<1x16xf32>
    %448 = arith.addf %446, %447 : vector<1x16xf32>
    %449 = math.tanh %448 : vector<1x16xf32>
    %450 = arith.mulf %445, %449 : vector<1x16xf32>
    %451 = vector.extract_strided_slice %254 {offsets = [0, 0], sizes = [1, 64], strides = [1, 1]} : vector<8x64xf32> to vector<1x64xf32>
    %cst_88 = arith.constant dense<0.000000e+00> : vector<1x64xf32>
    %452 = tpu.matmul %450, %15, %cst_88 {dimension_numbers = #tpu.dot_dimension_numbers<[1], [0], [0], [1], [0, 0, 1, 1], [], []>} : vector<1x16xf32>, vector<16x64xf32>, vector<1x64xf32> -> vector<1x64xf32>
    %453 = arith.addf %451, %452 : vector<1x64xf32>
    %454 = vector.extract_strided_slice %453 {offsets = [0, 0], sizes = [1, 16], strides = [1, 1]} : vector<1x64xf32> to vector<1x16xf32>
    %455 = arith.negf %454 : vector<1x16xf32>
    %456 = math.exp %455 : vector<1x16xf32>
    %cst_89 = arith.constant 1.000000e+00 : f32
    %457 = vector.broadcast %cst_89 : f32 to vector<1x16xf32>
    %458 = arith.addf %457, %456 : vector<1x16xf32>
    %459 = arith.divf %457, %458 : vector<1x16xf32>
    %460 = vector.extract_strided_slice %453 {offsets = [0, 16], sizes = [1, 16], strides = [1, 1]} : vector<1x64xf32> to vector<1x16xf32>
    %461 = arith.negf %460 : vector<1x16xf32>
    %462 = math.exp %461 : vector<1x16xf32>
    %cst_90 = arith.constant 1.000000e+00 : f32
    %463 = vector.broadcast %cst_90 : f32 to vector<1x16xf32>
    %464 = arith.addf %463, %462 : vector<1x16xf32>
    %465 = arith.divf %463, %464 : vector<1x16xf32>
    %466 = vector.extract_strided_slice %453 {offsets = [0, 32], sizes = [1, 16], strides = [1, 1]} : vector<1x64xf32> to vector<1x16xf32>
    %467 = math.tanh %466 : vector<1x16xf32>
    %468 = vector.extract_strided_slice %453 {offsets = [0, 48], sizes = [1, 16], strides = [1, 1]} : vector<1x64xf32> to vector<1x16xf32>
    %469 = arith.negf %468 : vector<1x16xf32>
    %470 = math.exp %469 : vector<1x16xf32>
    %cst_91 = arith.constant 1.000000e+00 : f32
    %471 = vector.broadcast %cst_91 : f32 to vector<1x16xf32>
    %472 = arith.addf %471, %470 : vector<1x16xf32>
    %473 = arith.divf %471, %472 : vector<1x16xf32>
    %474 = arith.mulf %465, %448 : vector<1x16xf32>
    %475 = arith.mulf %459, %467 : vector<1x16xf32>
    %476 = arith.addf %474, %475 : vector<1x16xf32>
    %477 = math.tanh %476 : vector<1x16xf32>
    %478 = arith.mulf %473, %477 : vector<1x16xf32>
    %479 = tpu.concatenate %478, %450, %422, %394, %366, %338, %310, %282 in 0 : vector<1x16xf32>, vector<1x16xf32>, vector<1x16xf32>, vector<1x16xf32>, vector<1x16xf32>, vector<1x16xf32>, vector<1x16xf32>, vector<1x16xf32> -> vector<8x16xf32>
    %480 = arith.index_cast %252 : i32 to index
    %c16 = arith.constant 16 : index
    %481 = vector.load %arg27[%480, %c16] : memref<8x32xf32, #tpu.memory_space<vmem>>, vector<8x16xf32>
    tpu.vector_store %arg27[%480, %c16], %479 {strides = array<i32>} : memref<8x32xf32, #tpu.memory_space<vmem>>, vector<8x16xf32>,
    %c1_i32_92 = arith.constant 1 : i32
    %c0_93 = arith.constant 0 : index
    %c0_94 = arith.constant 0 : index
    %482 = vector.load %arg27[%c0_93, %c0_94] : memref<8x32xf32, #tpu.memory_space<vmem>>, vector<8x32xf32>
    %c0_95 = arith.constant 0 : index
    %c0_96 = arith.constant 0 : index
    %483 = vector.load %arg9[%c0_95, %c0_96] : memref<32x16xf32, #tpu.memory_space<vmem>>, vector<32x16xf32>
    %cst_97 = arith.constant dense<0.000000e+00> : vector<8x16xf32>
    %484 = tpu.matmul %482, %483, %cst_97 {dimension_numbers = #tpu.dot_dimension_numbers<[1], [0], [0], [1], [0, 0, 1, 1], [], []>} : vector<8x32xf32>, vector<32x16xf32>, vector<8x16xf32> -> vector<8x16xf32>
    %c0_98 = arith.constant 0 : index
    %c0_99 = arith.constant 0 : index
    %485 = vector.load %arg10[%c0_98, %c0_99] : memref<1x16xf32, #tpu.memory_space<vmem>>, vector<1x16xf32>
    %486 = vector.broadcast %485 : vector<1x16xf32> to vector<8x16xf32>
    %487 = arith.addf %484, %486 : vector<8x16xf32>
    %488 = math.tanh %487 : vector<8x16xf32>
    %c0_100 = arith.constant 0 : index
    %c0_101 = arith.constant 0 : index
    %489 = vector.load %arg11[%c0_100, %c0_101] : memref<16x5xf32, #tpu.memory_space<vmem>>, vector<16x5xf32>
    %cst_102 = arith.constant dense<0.000000e+00> : vector<8x5xf32>
    %490 = tpu.matmul %488, %489, %cst_102 {dimension_numbers = #tpu.dot_dimension_numbers<[1], [0], [0], [1], [0, 0, 1, 1], [], []>} : vector<8x16xf32>, vector<16x5xf32>, vector<8x5xf32> -> vector<8x5xf32>
    %c0_103 = arith.constant 0 : index
    %c0_104 = arith.constant 0 : index
    %491 = vector.load %arg12[%c0_103, %c0_104] : memref<1x5xf32, #tpu.memory_space<vmem>>, vector<1x5xf32>
    %492 = vector.broadcast %491 : vector<1x5xf32> to vector<8x5xf32>
    %493 = arith.addf %490, %492 : vector<8x5xf32>
    %cst_105 = arith.constant dense<0xFF800000> : vector<8xf32>
    %494 = vector.multi_reduction <maximumf>, %493, %cst_105 [1] : vector<8x5xf32> to vector<8xf32>
    %495 = vector.shape_cast %494 : vector<8xf32> to vector<8x1xf32>
    %496 = tpu.iota {dimensions = array<i32: 1>} : vector<8x5xi32>
    %497 = vector.broadcast %495 : vector<8x1xf32> to vector<8x5xf32>
    %498 = arith.cmpf oeq, %493, %497 : vector<8x5xf32>
    %c5_i32 = arith.constant 5 : i32
    %499 = vector.broadcast %c5_i32 : i32 to vector<8x5xi32>
    %500 = arith.select %498, %496, %499 : vector<8x5xi1>, vector<8x5xi32>
    %cst_106 = arith.constant dense<2147483647> : vector<8xi32>
    %501 = vector.multi_reduction <minsi>, %500, %cst_106 [1] : vector<8x5xi32> to vector<8xi32>
    %c0_107 = arith.constant 0 : index
    %c0_108 = arith.constant 0 : index
    %c0_109 = arith.constant 0 : index
    %502 = vector.load %arg23[%c0_107, %c0_108, %c0_109] : memref<1x1x8xi32, #tpu.memory_space<vmem>>, vector<1x1x8xi32>
    %503 = vector.shape_cast %502 : vector<1x1x8xi32> to vector<8xi32>
    %504 = vector.shape_cast %501 : vector<8xi32> to vector<1x1x8xi32>
    tpu.vector_store %arg23[%c0_107, %c0_108, %c0_109], %504 {strides = array<i32>} : memref<1x1x8xi32, #tpu.memory_space<vmem>>, vector<1x1x8xi32>,
    %505 = vector.shape_cast %501 : vector<8xi32> to vector<8x1xi32>
    %506 = vector.broadcast %505 : vector<8x1xi32> to vector<8x5xi32>
    %507 = arith.cmpi eq, %496, %506 : vector<8x5xi32>
    %508 = arith.extui %507 : vector<8x5xi1> to vector<8x5xi32>
    %509 = arith.sitofp %508 : vector<8x5xi32> to vector<8x5xf32>
    %c0_110 = arith.constant 0 : index
    %c0_111 = arith.constant 0 : index
    %510 = vector.load %arg13[%c0_110, %c0_111] : memref<5x8xf32, #tpu.memory_space<vmem>>, vector<5x8xf32>
    %cst_112 = arith.constant dense<0.000000e+00> : vector<8x8xf32>
    %511 = tpu.matmul %509, %510, %cst_112 {dimension_numbers = #tpu.dot_dimension_numbers<[1], [0], [0], [1], [0, 0, 1, 1], [], []>} : vector<8x5xf32>, vector<5x8xf32>, vector<8x8xf32> -> vector<8x8xf32>
    %c0_113 = arith.constant 0 : index
    %c0_114 = arith.constant 0 : index
    %512 = vector.load %arg14[%c0_113, %c0_114] : memref<32x16xf32, #tpu.memory_space<vmem>>, vector<32x16xf32>
    %cst_115 = arith.constant dense<0.000000e+00> : vector<8x16xf32>
    %513 = tpu.matmul %482, %512, %cst_115 {dimension_numbers = #tpu.dot_dimension_numbers<[1], [0], [0], [1], [0, 0, 1, 1], [], []>} : vector<8x32xf32>, vector<32x16xf32>, vector<8x16xf32> -> vector<8x16xf32>
    %c0_116 = arith.constant 0 : index
    %c0_117 = arith.constant 0 : index
    %514 = vector.load %arg15[%c0_116, %c0_117] : memref<8x16xf32, #tpu.memory_space<vmem>>, vector<8x16xf32>
    %cst_118 = arith.constant dense<0.000000e+00> : vector<8x16xf32>
    %515 = tpu.matmul %511, %514, %cst_118 {dimension_numbers = #tpu.dot_dimension_numbers<[1], [0], [0], [1], [0, 0, 1, 1], [], []>} : vector<8x8xf32>, vector<8x16xf32>, vector<8x16xf32> -> vector<8x16xf32>
    %516 = arith.addf %513, %515 : vector<8x16xf32>
    %c0_119 = arith.constant 0 : index
    %c0_120 = arith.constant 0 : index
    %517 = vector.load %arg16[%c0_119, %c0_120] : memref<1x16xf32, #tpu.memory_space<vmem>>, vector<1x16xf32>
    %518 = vector.broadcast %517 : vector<1x16xf32> to vector<8x16xf32>
    %519 = arith.addf %516, %518 : vector<8x16xf32>
    %520 = math.tanh %519 : vector<8x16xf32>
    %c0_121 = arith.constant 0 : index
    %c0_122 = arith.constant 0 : index
    %521 = vector.load %arg17[%c0_121, %c0_122] : memref<32x16xf32, #tpu.memory_space<vmem>>, vector<32x16xf32>
    %cst_123 = arith.constant dense<0.000000e+00> : vector<8x16xf32>
    %522 = tpu.matmul %482, %521, %cst_123 {dimension_numbers = #tpu.dot_dimension_numbers<[1], [0], [0], [1], [0, 0, 1, 1], [], []>} : vector<8x32xf32>, vector<32x16xf32>, vector<8x16xf32> -> vector<8x16xf32>
    %c0_124 = arith.constant 0 : index
    %c0_125 = arith.constant 0 : index
    %523 = vector.load %arg18[%c0_124, %c0_125] : memref<8x16xf32, #tpu.memory_space<vmem>>, vector<8x16xf32>
    %cst_126 = arith.constant dense<0.000000e+00> : vector<8x16xf32>
    %524 = tpu.matmul %511, %523, %cst_126 {dimension_numbers = #tpu.dot_dimension_numbers<[1], [0], [0], [1], [0, 0, 1, 1], [], []>} : vector<8x8xf32>, vector<8x16xf32>, vector<8x16xf32> -> vector<8x16xf32>
    %525 = arith.addf %522, %524 : vector<8x16xf32>
    %c0_127 = arith.constant 0 : index
    %c0_128 = arith.constant 0 : index
    %526 = vector.load %arg19[%c0_127, %c0_128] : memref<1x16xf32, #tpu.memory_space<vmem>>, vector<1x16xf32>
    %527 = vector.broadcast %526 : vector<1x16xf32> to vector<8x16xf32>
    %528 = arith.addf %525, %527 : vector<8x16xf32>
    %529 = math.tanh %528 : vector<8x16xf32>
    %c0_129 = arith.constant 0 : index
    %c0_130 = arith.constant 0 : index
    %530 = vector.load %arg20[%c0_129, %c0_130] : memref<6x16xf32, #tpu.memory_space<vmem>>, vector<6x16xf32>
    %cst_131 = arith.constant dense<0.000000e+00> : vector<6x8xf32>
    %531 = tpu.matmul %530, %520, %cst_131 {dimension_numbers = #tpu.dot_dimension_numbers<[1], [1], [0], [0], [0, 0, 1, 0], [], []>} : vector<6x16xf32>, vector<8x16xf32>, vector<6x8xf32> -> vector<6x8xf32>
    %c0_132 = arith.constant 0 : index
    %c0_133 = arith.constant 0 : index
    %532 = vector.load %arg21[%c0_132, %c0_133] : memref<6x16xf32, #tpu.memory_space<vmem>>, vector<6x16xf32>
    %cst_134 = arith.constant dense<0.000000e+00> : vector<6x8xf32>
    %533 = tpu.matmul %532, %529, %cst_134 {dimension_numbers = #tpu.dot_dimension_numbers<[1], [1], [0], [0], [0, 0, 1, 0], [], []>} : vector<6x16xf32>, vector<8x16xf32>, vector<6x8xf32> -> vector<6x8xf32>
    %c0_135 = arith.constant 0 : index
    %c0_136 = arith.constant 0 : index
    %534 = vector.load %arg22[%c0_135, %c0_136] : memref<6x1xf32, #tpu.memory_space<vmem>>, vector<6x1xf32>
    %535 = vector.broadcast %534 : vector<6x1xf32> to vector<6x8xf32>
    %536 = arith.addf %533, %535 : vector<6x8xf32>
    %537 = vector.shape_cast %536 : vector<6x8xf32> to vector<6x8x1xf32>
    %538 = vector.shape_cast %531 : vector<6x8xf32> to vector<6x1x8xf32>
    %539 = vector.broadcast %537 : vector<6x8x1xf32> to vector<6x8x8xf32>
    %540 = vector.broadcast %538 : vector<6x1x8xf32> to vector<6x8x8xf32>
    %541 = arith.addf %539, %540 : vector<6x8x8xf32>
    %c0_137 = arith.constant 0 : index
    %c0_138 = arith.constant 0 : index
    %c0_139 = arith.constant 0 : index
    %542 = vector.load %arg2[%c0_137, %c0_138, %c0_139] : memref<1x1x8xf32, #tpu.memory_space<vmem>>, vector<1x1x8xf32>
    %543 = vector.shape_cast %542 : vector<1x1x8xf32> to vector<8xf32>
    %544 = vector.shape_cast %543 : vector<8xf32> to vector<8x1xf32>
    %cst_140 = arith.constant 0.000000e+00 : f32
    %545 = vector.broadcast %cst_140 : f32 to vector<8x1xf32>
    %546 = arith.cmpf ogt, %544, %545 : vector<8x1xf32>
    %547 = vector.shape_cast %543 : vector<8xf32> to vector<1x8xf32>
    %cst_141 = arith.constant 0.000000e+00 : f32
    %548 = vector.broadcast %cst_141 : f32 to vector<1x8xf32>
    %549 = arith.cmpf ogt, %547, %548 : vector<1x8xf32>
    %550 = vector.broadcast %546 : vector<8x1xi1> to vector<8x8xi1>
    %551 = vector.broadcast %549 : vector<1x8xi1> to vector<8x8xi1>
    %552 = arith.andi %550, %551 : vector<8x8xi1>
    %cst_142 = arith.constant 0.000000e+00 : f32
    %553 = vector.broadcast %cst_142 : f32 to vector<6x8x8xf32>
    %554 = arith.cmpf ogt, %541, %553 : vector<6x8x8xf32>
    %555 = vector.shape_cast %552 : vector<8x8xi1> to vector<1x8x8xi1>
    %556 = vector.broadcast %555 : vector<1x8x8xi1> to vector<6x8x8xi1>
    %557 = arith.andi %554, %556 : vector<6x8x8xi1>
    %558 = arith.extui %557 : vector<6x8x8xi1> to vector<6x8x8xi8>
    %c0_143 = arith.constant 0 : index
    %c0_144 = arith.constant 0 : index
    %c0_145 = arith.constant 0 : index
    %c0_146 = arith.constant 0 : index
    %559 = vector.load %arg24[%c0_143, %c0_144, %c0_145, %c0_146] : memref<1x6x8x8xi8, #tpu.memory_space<vmem>>, vector<1x6x8x8xi8>
    %560 = vector.shape_cast %559 : vector<1x6x8x8xi8> to vector<6x8x8xi8>
    %561 = vector.shape_cast %558 : vector<6x8x8xi8> to vector<1x6x8x8xi8>
    tpu.vector_store %arg24[%c0_143, %c0_144, %c0_145, %c0_146], %561 {strides = array<i32>} : memref<1x6x8x8xi8, #tpu.memory_space<vmem>>, vector<1x6x8x8xi8>,
    return
  }
  func.func @transform_0(%arg0: i32) -> (i32, i32, i32) {
    %c0_i32 = arith.constant 0 : i32
    %c0_i32_0 = arith.constant 0 : i32
    %c0_i32_1 = arith.constant 0 : i32
    return %arg0, %c0_i32, %c0_i32_0 : i32, i32, i32
  }
  func.func @transform_1(%arg0: i32) -> (i32, i32, i32) {
    %c0_i32 = arith.constant 0 : i32
    %c0_i32_0 = arith.constant 0 : i32
    %c0_i32_1 = arith.constant 0 : i32
    return %arg0, %c0_i32, %c0_i32_0 : i32, i32, i32
  }
  func.func @transform_2(%arg0: i32) -> (i32, i32) {
    %c0_i32 = arith.constant 0 : i32
    %c0_i32_0 = arith.constant 0 : i32
    %c0_i32_1 = arith.constant 0 : i32
    return %c0_i32, %c0_i32_0 : i32, i32
  }
  func.func @transform_3(%arg0: i32) -> (i32, i32) {
    %c0_i32 = arith.constant 0 : i32
    %c0_i32_0 = arith.constant 0 : i32
    %c0_i32_1 = arith.constant 0 : i32
    return %c0_i32, %c0_i32_0 : i32, i32
  }
  func.func @transform_4(%arg0: i32) -> (i32, i32) {
    %c0_i32 = arith.constant 0 : i32
    %c0_i32_0 = arith.constant 0 : i32
    %c0_i32_1 = arith.constant 0 : i32
    return %c0_i32, %c0_i32_0 : i32, i32
  }
  func.func @transform_5(%arg0: i32) -> (i32, i32) {
    %c0_i32 = arith.constant 0 : i32
    %c0_i32_0 = arith.constant 0 : i32
    %c0_i32_1 = arith.constant 0 : i32
    return %c0_i32, %c0_i32_0 : i32, i32
  }
  func.func @transform_6(%arg0: i32) -> (i32, i32) {
    %c0_i32 = arith.constant 0 : i32
    %c0_i32_0 = arith.constant 0 : i32
    %c0_i32_1 = arith.constant 0 : i32
    return %c0_i32, %c0_i32_0 : i32, i32
  }
  func.func @transform_7(%arg0: i32) -> (i32, i32) {
    %c0_i32 = arith.constant 0 : i32
    %c0_i32_0 = arith.constant 0 : i32
    %c0_i32_1 = arith.constant 0 : i32
    return %c0_i32, %c0_i32_0 : i32, i32
  }
  func.func @transform_8(%arg0: i32) -> (i32, i32) {
    %c0_i32 = arith.constant 0 : i32
    %c0_i32_0 = arith.constant 0 : i32
    %c0_i32_1 = arith.constant 0 : i32
    return %c0_i32, %c0_i32_0 : i32, i32
  }
  func.func @transform_9(%arg0: i32) -> (i32, i32) {
    %c0_i32 = arith.constant 0 : i32
    %c0_i32_0 = arith.constant 0 : i32
    %c0_i32_1 = arith.constant 0 : i32
    return %c0_i32, %c0_i32_0 : i32, i32
  }
  func.func @transform_10(%arg0: i32) -> (i32, i32) {
    %c0_i32 = arith.constant 0 : i32
    %c0_i32_0 = arith.constant 0 : i32
    %c0_i32_1 = arith.constant 0 : i32
    return %c0_i32, %c0_i32_0 : i32, i32
  }
  func.func @transform_11(%arg0: i32) -> (i32, i32) {
    %c0_i32 = arith.constant 0 : i32
    %c0_i32_0 = arith.constant 0 : i32
    %c0_i32_1 = arith.constant 0 : i32
    return %c0_i32, %c0_i32_0 : i32, i32
  }
  func.func @transform_12(%arg0: i32) -> (i32, i32) {
    %c0_i32 = arith.constant 0 : i32
    %c0_i32_0 = arith.constant 0 : i32
    %c0_i32_1 = arith.constant 0 : i32
    return %c0_i32, %c0_i32_0 : i32, i32
  }
  func.func @transform_13(%arg0: i32) -> (i32, i32) {
    %c0_i32 = arith.constant 0 : i32
    %c0_i32_0 = arith.constant 0 : i32
    %c0_i32_1 = arith.constant 0 : i32
    return %c0_i32, %c0_i32_0 : i32, i32
  }
  func.func @transform_14(%arg0: i32) -> (i32, i32) {
    %c0_i32 = arith.constant 0 : i32
    %c0_i32_0 = arith.constant 0 : i32
    %c0_i32_1 = arith.constant 0 : i32
    return %c0_i32, %c0_i32_0 : i32, i32
  }
  func.func @transform_15(%arg0: i32) -> (i32, i32) {
    %c0_i32 = arith.constant 0 : i32
    %c0_i32_0 = arith.constant 0 : i32
    %c0_i32_1 = arith.constant 0 : i32
    return %c0_i32, %c0_i32_0 : i32, i32
  }
  func.func @transform_16(%arg0: i32) -> (i32, i32) {
    %c0_i32 = arith.constant 0 : i32
    %c0_i32_0 = arith.constant 0 : i32
    %c0_i32_1 = arith.constant 0 : i32
    return %c0_i32, %c0_i32_0 : i32, i32
  }
  func.func @transform_17(%arg0: i32) -> (i32, i32) {
    %c0_i32 = arith.constant 0 : i32
    %c0_i32_0 = arith.constant 0 : i32
    %c0_i32_1 = arith.constant 0 : i32
    return %c0_i32, %c0_i32_0 : i32, i32
  }
  func.func @transform_18(%arg0: i32) -> (i32, i32) {
    %c0_i32 = arith.constant 0 : i32
    %c0_i32_0 = arith.constant 0 : i32
    %c0_i32_1 = arith.constant 0 : i32
    return %c0_i32, %c0_i32_0 : i32, i32
  }
  func.func @transform_19(%arg0: i32) -> (i32, i32) {
    %c0_i32 = arith.constant 0 : i32
    %c0_i32_0 = arith.constant 0 : i32
    %c0_i32_1 = arith.constant 0 : i32
    return %c0_i32, %c0_i32_0 : i32, i32
  }
  func.func @transform_20(%arg0: i32) -> (i32, i32) {
    %c0_i32 = arith.constant 0 : i32
    %c0_i32_0 = arith.constant 0 : i32
    %c0_i32_1 = arith.constant 0 : i32
    return %c0_i32, %c0_i32_0 : i32, i32
  }
  func.func @transform_21(%arg0: i32) -> (i32, i32) {
    %c0_i32 = arith.constant 0 : i32
    %c0_i32_0 = arith.constant 0 : i32
    %c0_i32_1 = arith.constant 0 : i32
    return %c0_i32, %c0_i32_0 : i32, i32
  }
  func.func @transform_22(%arg0: i32) -> (i32, i32, i32) {
    %c0_i32 = arith.constant 0 : i32
    %c0_i32_0 = arith.constant 0 : i32
    %c0_i32_1 = arith.constant 0 : i32
    return %arg0, %c0_i32, %c0_i32_0 : i32, i32, i32
  }
  func.func @transform_23(%arg0: i32) -> (i32, i32, i32, i32) {
    %c0_i32 = arith.constant 0 : i32
    %c0_i32_0 = arith.constant 0 : i32
    %c0_i32_1 = arith.constant 0 : i32
    %c0_i32_2 = arith.constant 0 : i32
    return %arg0, %c0_i32, %c0_i32_0, %c0_i32_1 : i32, i32, i32, i32
  }
}

</mosaic_0001>

<bundles_post_ra>
// kernel: tpu_custom_call.1
= control target key start
LH: loop header
LB: loop body
LE: loop exit
PB: predicated region body
PF: predicated region fallthrough
CT: control target
= control target key end

     0   :  { %s5080_s0 = inlined_call_operand.vmem [shape: f32[2,8,16], index: 0, kind: input, shape index: {}]   ;;  %s5081_s1 = inlined_call_operand.vmem [shape: f32[2,1,8], index: 1, kind: input, shape index: {}]   ;;  %s5082_s2 = inlined_call_operand.vmem [shape: f32[16,64], index: 2, kind: input, shape index: {}]   ;;  %s5083_s3 = inlined_call_operand.vmem [shape: f32[16,64], index: 3, kind: input, shape index: {}]   ;;  %s5084_s4 = inlined_call_operand.vmem [shape: f32[1,64], index: 4, kind: input, shape index: {}]   ;;  %s5085_s5 = inlined_call_operand.vmem [shape: f32[16,64], index: 5, kind: input, shape index: {}]   ;;  %s5086_s6 = inlined_call_operand.vmem [shape: f32[16,64], index: 6, kind: input, shape index: {}]   ;;  %s5087_s7 = inlined_call_operand.vmem [shape: f32[1,64], index: 7, kind: input, shape index: {}]   ;;  %s5088_s8 = inlined_call_operand.vmem [shape: f32[32,16], index: 8, kind: input, shape index: {}]   ;;  %s5089_s9 = inlined_call_operand.vmem [shape: f32[1,16], index: 9, kind: input, shape index: {}]   ;;  %s5090_s10 = inlined_call_operand.vmem [shape: f32[16,5], index: 10, kind: input, shape index: {}]   ;;  %s5091_s11 = inlined_call_operand.vmem [shape: f32[1,5], index: 11, kind: input, shape index: {}]   ;;  %s5092_s12 = inlined_call_operand.vmem [shape: f32[5,8], index: 12, kind: input, shape index: {}]   ;;  %s5093_s13 = inlined_call_operand.vmem [shape: f32[32,16], index: 13, kind: input, shape index: {}]   ;;  %s5094_s14 = inlined_call_operand.vmem [shape: f32[8,16], index: 14, kind: input, shape index: {}]   ;;  %s5095_s15 = inlined_call_operand.vmem [shape: f32[1,16], index: 15, kind: input, shape index: {}]   ;;  %s5096_s16 = inlined_call_operand.vmem [shape: f32[32,16], index: 16, kind: input, shape index: {}]   ;;  %s5097_s17 = inlined_call_operand.vmem [shape: f32[8,16], index: 17, kind: input, shape index: {}]   ;;  %s5098_s18 = inlined_call_operand.vmem [shape: f32[1,16], index: 18, kind: input, shape index: {}]   ;;  %s5099_s19 = inlined_call_operand.vmem [shape: f32[6,16], index: 19, kind: input, shape index: {}]   ;;  %s5100_s20 = inlined_call_operand.vmem [shape: f32[6,16], index: 20, kind: input, shape index: {}]   ;;  %s5101_s21 = inlined_call_operand.vmem [shape: f32[6,1], index: 21, kind: input, shape index: {}]   ;;  %s5102_s22 = inlined_call_operand.hbm [shape: s32[2,1,8], index: 22, kind: output, shape index: {0}]   ;;  %s5103_s23 = inlined_call_operand.hbm [shape: s8[2,6,8,8], index: 23, kind: output, shape index: {1}]  }
   0x1   :  { %5120 = sst [smem:[#allocation16_spill]] %s5080_s0 }
   0x2   :  { %5121 = sst [smem:[#allocation17_spill]] %s5081_s1 }
   0x3   :  { %5122 = sst [smem:[#allocation18_spill]] %s5082_s2 }
   0x4   :  { %5123 = sst [smem:[#allocation19_spill]] %s5083_s3 }
   0x5   :  { %5124 = sst [smem:[#allocation20_spill]] %s5084_s4 }
   0x6   :  { %5125 = sst [smem:[#allocation21_spill]] %s5085_s5 }
   0x7   :  { %5126 = sst [smem:[#allocation22_spill]] %s5086_s6 }
   0x8   :  { %5127 = sst [smem:[#allocation23_spill]] %s5087_s7 }
   0x9   :  { %5128 = sst [smem:[#allocation24_spill]] %s5088_s8 }
   0xa   :  { %5129 = sst [smem:[#allocation25_spill]] %s5089_s9 }
   0xb   :  { %5130 = sst [smem:[#allocation26_spill]] %s5090_s10 }
   0xc   :  { %5131 = sst [smem:[#allocation27_spill]] %s5091_s11 }
   0xd   :  { %29 = vsyncpa [#allocation6], 0 }
   0xe   :  { %31 = vsyncpa [#allocation6 + $0x1], 0 }
   0xf   :  { %32 = vsyncpa [#allocation8], 0 }
  0x10   :  { %34 = vsyncpa [#allocation8 + $0x1], 0  ;;  %s4436_s4 = smov 0   ;;  %s4438_s30 = smov 0  }
  0x11   :  { %s4440_s24 = smov 0   ;;  %s4442_s25 = smov 0  }
  0x12 LB: > { %5132 = sst [smem:[#allocation11_spill]] %s4291_s4  ;;  %s4457_s5 = sadd.s32 4294967295, %s4303_s25   ;;  %s4303_s25 = sphi %s4442_s25, %s5166_s25   ;;  %s4299_s24 = sphi %s4440_s24, %s5168_s24   ;;  %s4295_s30 = sphi %s4438_s30, %s5170_s30   ;;  %s4291_s4 = sphi %s4436_s4, %s5169_s4  }
  0x13   : > { %5133 = sst [smem:[#allocation12_spill]] %s4299_s24  ;;  %s3690_s1 = sadd.s32 4294967294, %s4303_s25  }
  0x14   : > { %s4461_s26 = sadd.s32 1, %s4303_s25   ;;  %s519_s2 = sadd.s32 1, %s4299_s24 }
  0x15   : > { %5134 = sst [smem:[#allocation13_spill]] %s4461_s26  ;;  %s516_s6 = ssub.s32 %s4303_s25, %s4461_s26 }
  0x16   : > { %p529_p0 = scmp.ne.s32.totalorder %s4299_s24, %s4295_s30  ;;  %p517_p1 = scmp.eq.s32.totalorder %s516_s6, 0 }
  0x17   : > { %p530_p2 = scmp.eq.s32.totalorder %s4457_s5, 1  ;;  %p535_p3 = scmp.ne.s32.totalorder %s4295_s30, %s4291_s4 }
  0x18   : > { %p536_p4 = scmp.eq.s32.totalorder %s3690_s1, 1  ;;  %p3693_p7 = scmp.ge.s32.totalorder %s4303_s25, 1 }
  0x19   : > { %s4472_s27 = scalar_select %p517_p1, %s4299_s24, %s519_s2  }
  0x1a   : > { %p4474_p5 = por %p530_p2, %p529_p0  ;;  %p4478_p6 = por %p536_p4, %p535_p3 }
  0x1b   : > { %5135 = sst [smem:[#allocation14_spill]] %s4472_s27  ;;  %p653_p8 = scmp.lt.s32.totalorder %s4303_s25, 3 }
  0x1c   : > { %s5137_s28 = scalar_select %p4478_p6, 1, 0 }
  0x1d   : > { %p654_p9 = pnand %p3693_p7, %p653_p8 }
  0x1e   : > { %5138 = sst [smem:[#allocation15_spill]] %s5137_s28  ;;  %p723_p10 = scmp.lt.s32.totalorder (!%p654_p9), %s4457_s5, 1 }
  0x1f   : > { %657 = sbr.rel (%p654_p9) target bundleno = 11388 (0x2c7c), region = 108  ;;  %s5139_s0 = sld [smem:[#allocation18_spill]] (!%p654_p9) }
  0x20   : > { %s5140_s2 = sld [smem:[#allocation16_spill]] (!%p654_p9)  ;;  %s5116_s28 = smov (!%p654_p9), 96  }
  0x21   : > { %s5141_s26 = sld [smem:[#allocation19_spill]] (!%p654_p9)  ;;  %s5118_s24 = smov (!%p654_p9), 32  }
  0x22   : > { %s5142_s27 = sld [smem:[#allocation20_spill]] (!%p654_p9) }
  0x23   : > { %s5143_s1 = sld [smem:[#allocation21_spill]] (!%p654_p9) }
  0x24   : > { %v4305_v1 = vmov 0.0   ;;  %vm4306_vm0 = vmmov 0   ;;  %s4495_s6 = scalar_select %p723_p10, %s4457_s5, 1  ;;  %vm742_vm1 = vcmask 130048   ;;  %vm816_vm2 = vcmask 523264  }
  0x25   : > { %v734_v0 = vld [vmem:[%s5139_s0 + $0x8] sm:$0xff]  ;;  %3832 = vmatprep.subr.mxu0 %v4305_v1  ;;  %v733_v2 = vld [vmem:[%s5139_s0] sm:$0xff]  ;;  %3836 = vmatprep.mubr.msk.f32.mxu0 %vm4306_vm0, %v4305_v1  ;;  %vm1749_vm3 = vcmask 1040384   ;;  %vm1751_vm4 = vcmask 1041408   ;;  %vm1753_vm5 = vcmask 1042432   ;;  %vm1755_vm6 = vcmask 1043456  }
  0x26   : > { %3833 = vmatpush3.msra.mxu0 %v734_v0  ;;  %3839 = vmatprep.subr.mxu1 %v4305_v1  ;;  %s3694_s29 = sshll.u32 %s4495_s6, 3  ;;  %vm1757_vm7 = vcmask 1044480   ;;  %s5145_s3 = sld [smem:[#allocation22_spill]]  ;;  %vm1759_vm8 = vcmask 1045504   ;;  %vm1761_vm9 = vcmask 1046528   ;;  %vm2624_vm10 = vcmask 261248  }
  0x27   : > { %3834 = vmatprep.subr.mxu0 %v4305_v1  ;;  %3843 = vmatprep.mubr.msk.f32.mxu1 %vm4306_vm0, %v4305_v1  ;;  %s726_s0 = scalar_lea.vmem %s5140_s2, %s3694_s29  ;;  %v4509_v3 = vld [vmem:[%s5141_s26 + $0x8] sm:$0xff]  ;;  %v4515_v5 = vld [vmem:[%s5141_s26] sm:$0xff]  ;;  %s5144_s2 = sld [smem:[#allocation23_spill]]  ;;  %vm2638_vm11 = vcmask 261120   ;;  %vm2795_vm12 = vcmask 39936   ;;  %vm2822_vm15 = vcmask 57344  }
  0x28   : > { %3835 = vmatpush3.msra.mxu0 %v733_v2  ;;  %v732_v4 = vld [vmem:[%s726_s0] sm:$0xff]  ;;  %s5114_s0 = smov 16   ;;  %s5147_s8 = sld [smem:[#allocation24_spill]] }
  0x29   : > { %3846 = vmatprep.subr.mxu0 %v4305_v1  ;;  %3837 = vmatmul.mubr.msk.f32.vlgmr.msra.gmra.mxu0 %vm742_vm1, %v732_v4  ;;  %v3695_v6 = vld [vmem:[%s5142_s27] ss:$0 sm:$0xff]  ;;  %v819_v24 = vld [vmem:[%s5143_s1 + $0x8] sm:$0xff]  ;;  %s4310_s27 = smov 80   ;;  %s5149_s10 = sld [smem:[#allocation26_spill]] }
  0x2a   : > { %3847 = vmatpush3.msra.mxu0 %v4509_v3  ;;  %3850 = vmatprep.mubr.msk.f32.mxu0 %vm4306_vm0, %v4305_v1  ;;  %v818_v25 = vld [vmem:[%s5143_s1] sm:$0xff]  ;;  %s5150_s9 = sld [smem:[#allocation25_spill]] }
  0x2b   : > { %3848 = vmatprep.subr.mxu0 %v4305_v1  ;;  %3840 = vmatpush3.msra.mxu1 %v819_v24  ;;  %s5151_s11 = sld [smem:[#allocation27_spill]] }
  0x2c   : > { %3849 = vmatpush3.msra.mxu0 %v4515_v5  ;;  %3841 = vmatprep.subr.mxu1 %v4305_v1 }
  0x2d   : > { %3851 = vmatmul.mubr.f32.vlgmr.msra.gmra.mxu0 %v4305_v1  ;;  %3860 = vmatprep.subr.mxu0 %v4305_v1  ;;  %v3697_v29 = vld [vmem:[%s5144_s2] ss:$0 sm:$0xff]  ;;  %s4858_s2 = sand.u32 1, %s4295_s30  }
  0x2e   : > { %3861 = vmatpush3.msra.mxu0 %v4509_v3  ;;  %3864 = vmatprep.mubr.msk.f32.mxu0 %vm4306_vm0, %v4305_v1 }
  0x2f   : > { %3862 = vmatprep.subr.mxu0 %v4305_v1  ;;  %3842 = vmatpush3.msra.mxu1 %v818_v25 }
  0x30   : > { %3863 = vmatpush3.msra.mxu0 %v4515_v5  ;;  %3844 = vmatmul.mubr.msk.f32.vlgmr.msra.gmra.mxu1 %vm742_vm1, %v732_v4 }
  0x31   : > { %3874 = vmatprep.subr.mxu0 %v4305_v1  ;;  %3853 = vmatprep.subr.mxu1 %v4305_v1 }
  0x32   : > { %3854 = vmatpush3.msra.mxu1 %v4509_v3  ;;  %3857 = vmatprep.mubr.msk.f32.mxu1 %vm4306_vm0, %v4305_v1 }
  0x33   : > { %3855 = vmatprep.subr.mxu1 %v4305_v1 }
  0x34   : > { %3856 = vmatpush3.msra.mxu1 %v4515_v5 }
  0x35   : > { %3867 = vmatprep.subr.mxu1 %v4305_v1 }
  0xe9   : > { %v812_v7 = vpop.f32.mrf.mxu0 }
  0xea   : > { %v813_v8 = vadd.f32 %v3695_v6, %v812_v7 }
  0xeb   : > { %v3838_v9 = vpop.f32.mrf.mxu0 }
  0xec   : > { %817 = vst.msk [vmem:[#allocation2] sm:$0xff] %vm816_vm2, %v813_v8 }
  0xed   : > { %v972_v10 = vpop.f32.mrf.mxu0 }
  0xef   : > { %v3852_v11 = vpop.f32.mrf.mxu0 }
  0xf0   : > { %v893_v30 = vpop.f32.mrf.mxu1 }
  0xf1   : > { %v894_v31 = vadd.f32 %v3697_v29, %v893_v30 }
  0xf2   : > { %v3845_v32 = vpop.f32.mrf.mxu1 }
  0xf3   : > { %v4534_v12 = vld [vmem:[#allocation2] sm:$0xff]  ;;  %897 = vst.msk [vmem:[#allocation3] sm:$0xff] %vm816_vm2, %v894_v31 }
  0xf4   : > { %v976_v13 = vadd.f32 %v972_v10, %v4534_v12 }
  0xf6   : > { %4079 = vtanh.f32 %v976_v13  ;;  %v3699_v15 = vmul.f32 -1.442695, %v976_v13 }
  0xf8   : > { %4081 = vpow2.f32 %v3699_v15 }
 0x103   : > { %v4080_v14 = vpop.eup %4079 }
 0x104   : > { %986 = vrot.lane.b32.xlu0 %v4080_v14, %s5116_s28 }
 0x105   : > { %v4082_v16 = vpop.eup %4081 }
 0x106   : > { %v980_v17 = vadd.f32 1.0, %v4082_v16 }
 0x108   : > { %4083 = vrcp.f32 %v980_v17 }
 0x115   : > { %v4084_v18 = vpop.eup %4083 }
 0x116   : > { %v984_v21 = vmul.f32 0.0, %v4084_v18 }
 0x176   : > { %v987_v19 = vpop.permute.xlu0 %986 }
 0x177   : > { %v989_v20 = vmul.f32 %v4084_v18, %v987_v19 }
 0x179   : > { %991 = vrot.lane.b32.xlu0 %v989_v20, %s5114_s0 }
 0x1eb   : > { %v992_v22 = vpop.permute.xlu0 %991 }
 0x1ec   : > { %v994_v23 = vadd.f32 %v992_v22, %v984_v21 }
 0x1ee   : > { %4085 = vtanh.f32 %v994_v23  ;;  %v1088_v45 = vrot.slane %v994_v23, 7 }
 0x1fb   : > { %v4086_v26 = vpop.eup %4085 }
 0x1fc   : > { %997 = vrot.lane.b32.xlu1 %v4086_v26, %s5118_s24 }
 0x26e   : > { %v998_v27 = vpop.permute.xlu1 %997 }
 0x26f   : > { %v4555_v28 = vmul.f32 %v4084_v18, %v998_v27 }
 0x271   : > { %1002 = vrot.lane.b32.xlu1 %v4555_v28, %s4310_s27 }
 0x2e3   : > { %v1003_v33 = vpop.permute.xlu1 %1002 }
 0x2e4   : > { %3858 = vmatmul.mubr.msk.f32.vlgmr.msra.gmra.mxu1 %vm742_vm1, %v1003_v33 }
 0x2e5   : > { %3868 = vmatpush3.msra.mxu1 %v4509_v3  ;;  %3871 = vmatprep.mubr.msk.f32.mxu1 %vm4306_vm0, %v4305_v1 }
 0x2e6   : > { %3869 = vmatprep.subr.mxu1 %v4305_v1 }
 0x2e7   : > { %3870 = vmatpush3.msra.mxu1 %v4515_v5 }
 0x2e8   : > { %3881 = vmatprep.subr.mxu1 %v4305_v1 }
 0x3a4   : > { %v1072_v34 = vpop.f32.mrf.mxu1 }
 0x3a5   : > { %v1077_v35 = vrot.slane %v1072_v34, 7 }
 0x3a6   : > { %v3859_v36 = vpop.f32.mrf.mxu1 }
 0x3a7   : > { %v1079_v37 = vadd.f32 %v1077_v35, %v4534_v12 }
 0x3a9   : > { %4087 = vtanh.f32 %v1079_v37  ;;  %v3701_v39 = vmul.f32 -1.442695, %v1079_v37 }
 0x3ab   : > { %4089 = vpow2.f32 %v3701_v39 }
 0x3b6   : > { %v4088_v38 = vpop.eup %4087 }
 0x3b7   : > { %1092 = vrot.lane.b32.xlu0 %v4088_v38, %s5116_s28 }
 0x3b8   : > { %v4090_v40 = vpop.eup %4089 }
 0x3b9   : > { %v1083_v41 = vadd.f32 1.0, %v4090_v40 }
 0x3bb   : > { %4091 = vrcp.f32 %v1083_v41 }
 0x3c8   : > { %v4092_v42 = vpop.eup %4091 }
 0x3c9   : > { %v1090_v46 = vmul.f32 %v4092_v42, %v1088_v45 }
 0x429   : > { %v1093_v43 = vpop.permute.xlu0 %1092 }
 0x42a   : > { %v1095_v44 = vmul.f32 %v4092_v42, %v1093_v43 }
 0x42c   : > { %1097 = vrot.lane.b32.xlu1 %v1095_v44, %s5114_s0 }
 0x49e   : > { %v1098_v47 = vpop.permute.xlu1 %1097 }
 0x49f   : > { %v1100_v48 = vadd.f32 %v1098_v47, %v1090_v46 }
 0x4a1   : > { %4093 = vtanh.f32 %v1100_v48  ;;  %v1195_v2 = vrot.slane %v1100_v48, 7 }
 0x4ae   : > { %v4094_v49 = vpop.eup %4093 }
 0x4af   : > { %1103 = vrot.lane.b32.xlu0 %v4094_v49, %s5118_s24 }
 0x521   : > { %v1104_v50 = vpop.permute.xlu0 %1103 }
 0x522   : > { %v1106_v51 = vmul.f32 %v4092_v42, %v1104_v50 }
 0x524   : > { %v1108_v52 = vrot.slane %v1106_v51, 1  ;;  %v1750_v11 = vsel %vm1749_vm3, %v4555_v28, %v1106_v51 }
 0x526   : > { %1109 = vrot.lane.b32.xlu1 %v1108_v52, %s4310_s27 }
 0x598   : > { %v1110_v53 = vpop.permute.xlu1 %1109 }
 0x599   : > { %3865 = vmatmul.mubr.msk.f32.vlgmr.msra.gmra.mxu0 %vm742_vm1, %v1110_v53 }
 0x59a   : > { %3875 = vmatpush3.msra.mxu0 %v4509_v3  ;;  %3878 = vmatprep.mubr.msk.f32.mxu0 %vm4306_vm0, %v4305_v1 }
 0x59b   : > { %3876 = vmatprep.subr.mxu0 %v4305_v1 }
 0x59c   : > { %3877 = vmatpush3.msra.mxu0 %v4515_v5 }
 0x59d   : > { %3888 = vmatprep.subr.mxu0 %v4305_v1 }
 0x659   : > { %v1179_v54 = vpop.f32.mrf.mxu0 }
 0x65a   : > { %v1184_v55 = vrot.slane %v1179_v54, 6 }
 0x65b   : > { %v3866_v56 = vpop.f32.mrf.mxu0 }
 0x65c   : > { %v1186_v57 = vadd.f32 %v1184_v55, %v4534_v12 }
 0x65e   : > { %4095 = vtanh.f32 %v1186_v57  ;;  %v3703_v59 = vmul.f32 -1.442695, %v1186_v57 }
 0x660   : > { %4097 = vpow2.f32 %v3703_v59 }
 0x66b   : > { %v4096_v58 = vpop.eup %4095 }
 0x66c   : > { %1199 = vrot.lane.b32.xlu0 %v4096_v58, %s5116_s28 }
 0x66d   : > { %v4098_v60 = vpop.eup %4097 }
 0x66e   : > { %v1190_v61 = vadd.f32 1.0, %v4098_v60 }
 0x670   : > { %4099 = vrcp.f32 %v1190_v61 }
 0x67d   : > { %v4100_v62 = vpop.eup %4099 }
 0x67e   : > { %v1197_v4 = vmul.f32 %v4100_v62, %v1195_v2 }
 0x6de   : > { %v1200_v63 = vpop.permute.xlu0 %1199 }
 0x6df   : > { %v1202_v0 = vmul.f32 %v4100_v62, %v1200_v63 }
 0x6e1   : > { %1204 = vrot.lane.b32.xlu1 %v1202_v0, %s5114_s0 }
 0x753   : > { %v1205_v6 = vpop.permute.xlu1 %1204 }
 0x754   : > { %v1207_v7 = vadd.f32 %v1205_v6, %v1197_v4 }
 0x756   : > { %4101 = vtanh.f32 %v1207_v7  ;;  %v1302_v27 = vrot.slane %v1207_v7, 7 }
 0x763   : > { %v4102_v8 = vpop.eup %4101 }
 0x764   : > { %1210 = vrot.lane.b32.xlu0 %v4102_v8, %s5118_s24 }
 0x7d6   : > { %v1211_v9 = vpop.permute.xlu0 %1210 }
 0x7d7   : > { %v1213_v10 = vmul.f32 %v4100_v62, %v1211_v9 }
 0x7d9   : > { %v1215_v13 = vrot.slane %v1213_v10, 2  ;;  %v1752_v14 = vsel %vm1751_vm4, %v1750_v11, %v1213_v10 }
 0x7db   : > { %1216 = vrot.lane.b32.xlu1 %v1215_v13, %s4310_s27 }
 0x84d   : > { %v1217_v15 = vpop.permute.xlu1 %1216 }
 0x84e   : > { %3872 = vmatmul.mubr.msk.f32.vlgmr.msra.gmra.mxu1 %vm742_vm1, %v1217_v15 }
 0x84f   : > { %3882 = vmatpush3.msra.mxu1 %v4509_v3  ;;  %3885 = vmatprep.mubr.msk.f32.mxu1 %vm4306_vm0, %v4305_v1 }
 0x850   : > { %3883 = vmatprep.subr.mxu1 %v4305_v1 }
 0x851   : > { %3884 = vmatpush3.msra.mxu1 %v4515_v5 }
 0x852   : > { %3895 = vmatprep.subr.mxu1 %v4305_v1 }
 0x90e   : > { %v1286_v16 = vpop.f32.mrf.mxu1 }
 0x90f   : > { %v1291_v17 = vrot.slane %v1286_v16, 5  ;;  %v4634_v16 = vld [vmem:[%s5145_s3 + $0x8] sm:$0xff] }
 0x910   : > { %v3873_v18 = vpop.f32.mrf.mxu1 }
 0x911   : > { %v1293_v19 = vadd.f32 %v1291_v17, %v4534_v12  ;;  %v4640_v18 = vld [vmem:[%s5145_s3] sm:$0xff] }
 0x913   : > { %4103 = vtanh.f32 %v1293_v19  ;;  %v3705_v21 = vmul.f32 -1.442695, %v1293_v19 }
 0x915   : > { %4105 = vpow2.f32 %v3705_v21 }
 0x920   : > { %v4104_v20 = vpop.eup %4103 }
 0x921   : > { %1306 = vrot.lane.b32.xlu0 %v4104_v20, %s5116_s28 }
 0x922   : > { %v4106_v22 = vpop.eup %4105 }
 0x923   : > { %v1297_v23 = vadd.f32 1.0, %v4106_v22 }
 0x925   : > { %4107 = vrcp.f32 %v1297_v23 }
 0x932   : > { %v4108_v24 = vpop.eup %4107 }
 0x933   : > { %v1304_v28 = vmul.f32 %v4108_v24, %v1302_v27 }
 0x993   : > { %v1307_v25 = vpop.permute.xlu0 %1306 }
 0x994   : > { %v1309_v26 = vmul.f32 %v4108_v24, %v1307_v25  ;;  %v4656_v25 = vld [vmem:[#allocation3] sm:$0xff] }
 0x996   : > { %1311 = vrot.lane.b32.xlu1 %v1309_v26, %s5114_s0 }
 0xa08   : > { %v1312_v29 = vpop.permute.xlu1 %1311 }
 0xa09   : > { %v1314_v30 = vadd.f32 %v1312_v29, %v1304_v28 }
 0xa0b   : > { %4109 = vtanh.f32 %v1314_v30  ;;  %v1409_v48 = vrot.slane %v1314_v30, 7 }
 0xa18   : > { %v4110_v31 = vpop.eup %4109 }
 0xa19   : > { %1317 = vrot.lane.b32.xlu0 %v4110_v31, %s5118_s24 }
 0xa8b   : > { %v1318_v32 = vpop.permute.xlu0 %1317 }
 0xa8c   : > { %v1320_v33 = vmul.f32 %v4108_v24, %v1318_v32 }
 0xa8e   : > { %v1322_v34 = vrot.slane %v1320_v33, 3  ;;  %v1754_v35 = vsel %vm1753_vm5, %v1752_v14, %v1320_v33 }
 0xa90   : > { %1323 = vrot.lane.b32.xlu1 %v1322_v34, %s4310_s27 }
 0xb02   : > { %v1324_v36 = vpop.permute.xlu1 %1323 }
 0xb03   : > { %3879 = vmatmul.mubr.msk.f32.vlgmr.msra.gmra.mxu0 %vm742_vm1, %v1324_v36 }
 0xb04   : > { %3889 = vmatpush3.msra.mxu0 %v4509_v3  ;;  %3892 = vmatprep.mubr.msk.f32.mxu0 %vm4306_vm0, %v4305_v1 }
 0xb05   : > { %3890 = vmatprep.subr.mxu0 %v4305_v1 }
 0xb06   : > { %3891 = vmatpush3.msra.mxu0 %v4515_v5 }
 0xb07   : > { %3902 = vmatprep.subr.mxu0 %v4305_v1 }
 0xbc3   : > { %v1393_v37 = vpop.f32.mrf.mxu0 }
 0xbc4   : > { %v1398_v38 = vrot.slane %v1393_v37, 4 }
 0xbc5   : > { %v3880_v39 = vpop.f32.mrf.mxu0 }
 0xbc6   : > { %v1400_v40 = vadd.f32 %v1398_v38, %v4534_v12 }
 0xbc8   : > { %4111 = vtanh.f32 %v1400_v40  ;;  %v3707_v42 = vmul.f32 -1.442695, %v1400_v40 }
 0xbca   : > { %4113 = vpow2.f32 %v3707_v42 }
 0xbd5   : > { %v4112_v41 = vpop.eup %4111 }
 0xbd6   : > { %1413 = vrot.lane.b32.xlu0 %v4112_v41, %s5116_s28 }
 0xbd7   : > { %v4114_v43 = vpop.eup %4113 }
 0xbd8   : > { %v1404_v44 = vadd.f32 1.0, %v4114_v43 }
 0xbda   : > { %4115 = vrcp.f32 %v1404_v44 }
 0xbe7   : > { %v4116_v45 = vpop.eup %4115 }
 0xbe8   : > { %v1411_v49 = vmul.f32 %v4116_v45, %v1409_v48 }
 0xc48   : > { %v1414_v46 = vpop.permute.xlu0 %1413 }
 0xc49   : > { %v1416_v47 = vmul.f32 %v4116_v45, %v1414_v46 }
 0xc4b   : > { %1418 = vrot.lane.b32.xlu1 %v1416_v47, %s5114_s0 }
 0xcbd   : > { %v1419_v50 = vpop.permute.xlu1 %1418 }
 0xcbe   : > { %v1421_v51 = vadd.f32 %v1419_v50, %v1411_v49 }
 0xcc0   : > { %4117 = vtanh.f32 %v1421_v51 }
 0xccd   : > { %v4118_v52 = vpop.eup %4117 }
 0xcce   : > { %1424 = vrot.lane.b32.xlu0 %v4118_v52, %s5118_s24 }
 0xd40   : > { %v1425_v53 = vpop.permute.xlu0 %1424 }
 0xd41   : > { %v1427_v54 = vmul.f32 %v4116_v45, %v1425_v53 }
 0xd43   : > { %v1429_v55 = vrot.slane %v1427_v54, 4  ;;  %v1756_v56 = vsel %vm1755_vm6, %v1754_v35, %v1427_v54 }
 0xd45   : > { %1430 = vrot.lane.b32.xlu1 %v1429_v55, %s4310_s27 }
 0xdb7   : > { %v1431_v57 = vpop.permute.xlu1 %1430 }
 0xdb8   : > { %3886 = vmatmul.mubr.msk.f32.vlgmr.msra.gmra.mxu1 %vm742_vm1, %v1431_v57 }
 0xdb9   : > { %3896 = vmatpush3.msra.mxu1 %v4509_v3  ;;  %3899 = vmatprep.mubr.msk.f32.mxu1 %vm4306_vm0, %v4305_v1 }
 0xdba   : > { %3897 = vmatprep.subr.mxu1 %v4305_v1 }
 0xdbb   : > { %3898 = vmatpush3.msra.mxu1 %v4515_v5  ;;  %v1516_v5 = vrot.slane %v1421_v51, 7 }
 0xdbc   : > { %3909 = vmatprep.subr.mxu1 %v4305_v1 }
 0xe78   : > { %v1500_v58 = vpop.f32.mrf.mxu1 }
 0xe79   : > { %v1505_v59 = vrot.slane %v1500_v58, 3 }
 0xe7a   : > { %v3887_v60 = vpop.f32.mrf.mxu1 }
 0xe7b   : > { %v1507_v61 = vadd.f32 %v1505_v59, %v4534_v12 }
 0xe7d   : > { %4119 = vtanh.f32 %v1507_v61  ;;  %v3709_v63 = vmul.f32 -1.442695, %v1507_v61 }
 0xe7f   : > { %4121 = vpow2.f32 %v3709_v63 }
 0xe8a   : > { %v4120_v62 = vpop.eup %4119 }
 0xe8b   : > { %1520 = vrot.lane.b32.xlu0 %v4120_v62, %s5116_s28 }
 0xe8c   : > { %v4122_v3 = vpop.eup %4121 }
 0xe8d   : > { %v1511_v0 = vadd.f32 1.0, %v4122_v3 }
 0xe8f   : > { %4123 = vrcp.f32 %v1511_v0 }
 0xe9c   : > { %v4124_v2 = vpop.eup %4123 }
 0xe9d   : > { %v1518_v7 = vmul.f32 %v4124_v2, %v1516_v5 }
 0xefd   : > { %v1521_v4 = vpop.permute.xlu0 %1520 }
 0xefe   : > { %v1523_v6 = vmul.f32 %v4124_v2, %v1521_v4 }
 0xf00   : > { %1525 = vrot.lane.b32.xlu1 %v1523_v6, %s5114_s0  ;;  %s5146_s0 = smov 16  }
 0xf72   : > { %v1526_v8 = vpop.permute.xlu1 %1525 }
 0xf73   : > { %v1528_v9 = vadd.f32 %v1526_v8, %v1518_v7 }
 0xf75   : > { %4125 = vtanh.f32 %v1528_v9  ;;  %v1623_v42 = vrot.slane %v1528_v9, 7 }
 0xf82   : > { %v4126_v10 = vpop.eup %4125 }
 0xf83   : > { %1531 = vrot.lane.b32.xlu0 %v4126_v10, %s5118_s24 }
 0xff5   : > { %v1532_v11 = vpop.permute.xlu0 %1531 }
 0xff6   : > { %v1534_v13 = vmul.f32 %v4124_v2, %v1532_v11 }
 0xff8   : > { %v1536_v14 = vrot.slane %v1534_v13, 5  ;;  %v4628_v15 = vsel %vm1757_vm7, %v1756_v56, %v1534_v13 }
 0xffa   : > { %1537 = vrot.lane.b32.xlu1 %v1536_v14, %s4310_s27 }
0x106c   : > { %v1538_v17 = vpop.permute.xlu1 %1537 }
0x106d   : > { %3893 = vmatmul.mubr.msk.f32.vlgmr.msra.gmra.mxu0 %vm742_vm1, %v1538_v17 }
0x106e   : > { %3903 = vmatpush3.msra.mxu0 %v4634_v16  ;;  %3906 = vmatprep.mubr.msk.f32.mxu0 %vm4306_vm0, %v4305_v1 }
0x106f   : > { %3904 = vmatprep.subr.mxu0 %v4305_v1 }
0x1070   : > { %3905 = vmatpush3.msra.mxu0 %v4640_v18 }
0x1071   : > { %3907 = vmatmul.mubr.f32.vlgmr.msra.gmra.mxu0 %v4305_v1  ;;  %3916 = vmatprep.subr.mxu0 %v4305_v1 }
0x1072   : > { %3917 = vmatpush3.msra.mxu0 %v4634_v16  ;;  %3920 = vmatprep.mubr.msk.f32.mxu0 %vm4306_vm0, %v4305_v1 }
0x1073   : > { %3918 = vmatprep.subr.mxu0 %v4305_v1 }
0x1074   : > { %3919 = vmatpush3.msra.mxu0 %v4640_v18 }
0x1075   : > { %3930 = vmatprep.subr.mxu0 %v4305_v1 }
0x112d   : > { %v1607_v19 = vpop.f32.mrf.mxu0 }
0x112e   : > { %v1612_v20 = vrot.slane %v1607_v19, 2 }
0x112f   : > { %v3894_v21 = vpop.f32.mrf.mxu0 }
0x1130   : > { %v1614_v22 = vadd.f32 %v1612_v20, %v4534_v12 }
0x1131   : > { %v1835_v23 = vpop.f32.mrf.mxu0 }
0x1132   : > { %4127 = vtanh.f32 %v1614_v22  ;;  %v1840_v24 = vrot.slane %v1835_v23, 1  ;;  %v3711_v30 = vmul.f32 -1.442695, %v1614_v22 }
0x1133   : > { %v3908_v26 = vpop.f32.mrf.mxu0 }
0x1134   : > { %v1842_v27 = vadd.f32 %v1840_v24, %v4656_v25 }
0x1136   : > { %4129 = vtanh.f32 %v1842_v27  ;;  %v3714_v31 = vmul.f32 -1.442695, %v1842_v27 }
0x1137   : > { %4131 = vpow2.f32 %v3711_v30 }
0x1138   : > { %4133 = vpow2.f32 %v3714_v31 }
0x113f   : > { %v4128_v28 = vpop.eup %4127 }
0x1140   : > { %1627 = vrot.lane.b32.xlu0 %v4128_v28, %s5116_s28 }
0x1143   : > { %v4130_v29 = vpop.eup %4129 }
0x1144   : > { %1852 = vrot.lane.b32.xlu1 %v4130_v29, %s5116_s28  ;;  %v4132_v32 = vpop.eup %4131 }
0x1145   : > { %v1618_v33 = vadd.f32 1.0, %v4132_v32  ;;  %v4134_v34 = vpop.eup %4133 }
0x1146   : > { %v1846_v35 = vadd.f32 1.0, %v4134_v34 }
0x1147   : > { %4135 = vrcp.f32 %v1618_v33 }
0x1148   : > { %4137 = vrcp.f32 %v1846_v35 }
0x1154   : > { %v4136_v36 = vpop.eup %4135 }
0x1155   : > { %v4138_v39 = vpop.eup %4137  ;;  %v1625_v43 = vmul.f32 %v4136_v36, %v1623_v42 }
0x1156   : > { %v1850_v46 = vmul.f32 0.0, %v4138_v39 }
0x11b2   : > { %v1628_v37 = vpop.permute.xlu0 %1627 }
0x11b3   : > { %v1630_v38 = vmul.f32 %v4136_v36, %v1628_v37 }
0x11b5   : > { %1632 = vrot.lane.b32.xlu0 %v1630_v38, %s5146_s0 }
0x11b6   : > { %v1853_v40 = vpop.permute.xlu1 %1852 }
0x11b7   : > { %v1855_v41 = vmul.f32 %v4138_v39, %v1853_v40 }
0x11b9   : > { %1857 = vrot.lane.b32.xlu1 %v1855_v41, %s5146_s0 }
0x1227   : > { %v1633_v44 = vpop.permute.xlu0 %1632 }
0x1228   : > { %v4663_v45 = vadd.f32 %v1633_v44, %v1625_v43 }
0x122a   : > { %4139 = vtanh.f32 %v4663_v45 }
0x122b   : > { %v1858_v47 = vpop.permute.xlu1 %1857 }
0x122c   : > { %v1860_v48 = vadd.f32 %v1858_v47, %v1850_v46 }
0x122e   : > { %4141 = vtanh.f32 %v1860_v48  ;;  %v1955_v10 = vrot.slane %v1860_v48, 1 }
0x1237   : > { %v4140_v49 = vpop.eup %4139 }
0x1238   : > { %1638 = vrot.lane.b32.xlu0 %v4140_v49, %s5118_s24 }
0x123b   : > { %v4142_v50 = vpop.eup %4141 }
0x123c   : > { %1863 = vrot.lane.b32.xlu1 %v4142_v50, %s5118_s24 }
0x12aa   : > { %v1639_v51 = vpop.permute.xlu0 %1638 }
0x12ab   : > { %v1641_v52 = vmul.f32 %v4136_v36, %v1639_v51 }
0x12ad   : > { %v1643_v53 = vrot.slane %v1641_v52, 6  ;;  %v4670_v54 = vsel %vm1759_vm8, %v4628_v15, %v1641_v52 }
0x12ae   : > { %v1864_v55 = vpop.permute.xlu1 %1863 }
0x12af   : > { %v4672_v56 = vmul.f32 %v4138_v39, %v1864_v55  ;;  %1644 = vrot.lane.b32.xlu0 %v1643_v53, %s4310_s27 }
0x12b1   : > { %v1868_v57 = vrot.slane %v4672_v56, 7 }
0x12b3   : > { %1869 = vrot.lane.b32.xlu1 %v1868_v57, %s4310_s27 }
0x1321   : > { %v1645_v58 = vpop.permute.xlu0 %1644 }
0x1322   : > { %3900 = vmatmul.mubr.msk.f32.vlgmr.msra.gmra.mxu1 %vm742_vm1, %v1645_v58 }
0x1323   : > { %3910 = vmatpush3.msra.mxu1 %v4634_v16  ;;  %3913 = vmatprep.mubr.msk.f32.mxu1 %vm4306_vm0, %v4305_v1 }
0x1324   : > { %3911 = vmatprep.subr.mxu1 %v4305_v1 }
0x1325   : > { %3912 = vmatpush3.msra.mxu1 %v4640_v18  ;;  %v1870_v59 = vpop.permute.xlu1 %1869 }
0x1326   : > { %3914 = vmatmul.mubr.msk.f32.vlgmr.msra.gmra.mxu1 %vm742_vm1, %v1870_v59  ;;  %3923 = vmatprep.subr.mxu1 %v4305_v1 }
0x1327   : > { %3924 = vmatpush3.msra.mxu1 %v4634_v16  ;;  %3927 = vmatprep.mubr.msk.f32.mxu1 %vm4306_vm0, %v4305_v1 }
0x1328   : > { %3925 = vmatprep.subr.mxu1 %v4305_v1 }
0x1329   : > { %3926 = vmatpush3.msra.mxu1 %v4640_v18 }
0x132a   : > { %3937 = vmatprep.subr.mxu1 %v4305_v1 }
0x13e2   : > { %v4691_v60 = vpop.f32.mrf.mxu1 }
0x13e4   : > { %v3901_v61 = vpop.f32.mrf.mxu1 }
0x13e6   : > { %v1939_v62 = vpop.f32.mrf.mxu1 }
0x13e7   : > { %v1944_v63 = vrot.slane %v1939_v62, 2 }
0x13e8   : > { %v3915_v3 = vpop.f32.mrf.mxu1 }
0x13e9   : > { %v1946_v0 = vadd.f32 %v1944_v63, %v4656_v25 }
0x13eb   : > { %4143 = vtanh.f32 %v1946_v0  ;;  %v3716_v4 = vmul.f32 -1.442695, %v1946_v0 }
0x13ed   : > { %4145 = vpow2.f32 %v3716_v4 }
0x13f8   : > { %v4144_v2 = vpop.eup %4143 }
0x13f9   : > { %1959 = vrot.lane.b32.xlu0 %v4144_v2, %s5116_s28 }
0x13fa   : > { %v4146_v6 = vpop.eup %4145 }
0x13fb   : > { %v1950_v5 = vadd.f32 1.0, %v4146_v6 }
0x13fd   : > { %4147 = vrcp.f32 %v1950_v5 }
0x140a   : > { %v4148_v7 = vpop.eup %4147 }
0x140b   : > { %v1957_v11 = vmul.f32 %v4148_v7, %v1955_v10 }
0x146b   : > { %v1960_v8 = vpop.permute.xlu0 %1959 }
0x146c   : > { %v1962_v9 = vmul.f32 %v4148_v7, %v1960_v8 }
0x146e   : > { %1964 = vrot.lane.b32.xlu1 %v1962_v9, %s5146_s0 }
0x14e0   : > { %v1965_v13 = vpop.permute.xlu1 %1964 }
0x14e1   : > { %v1967_v14 = vadd.f32 %v1965_v13, %v1957_v11 }
0x14e3   : > { %4149 = vtanh.f32 %v1967_v14  ;;  %v2062_v34 = vrot.slane %v1967_v14, 1 }
0x14f0   : > { %v4150_v15 = vpop.eup %4149 }
0x14f1   : > { %1970 = vrot.lane.b32.xlu0 %v4150_v15, %s5118_s24 }
0x1563   : > { %v1971_v17 = vpop.permute.xlu0 %1970 }
0x1564   : > { %v4697_v19 = vmul.f32 %v4148_v7, %v1971_v17 }
0x1566   : > { %v1975_v20 = vrot.slane %v4697_v19, 6 }
0x1568   : > { %1976 = vrot.lane.b32.xlu1 %v1975_v20, %s4310_s27 }
0x15da   : > { %v1977_v21 = vpop.permute.xlu1 %1976 }
0x15db   : > { %3921 = vmatmul.mubr.msk.f32.vlgmr.msra.gmra.mxu0 %vm742_vm1, %v1977_v21 }
0x15dc   : > { %3931 = vmatpush3.msra.mxu0 %v4634_v16  ;;  %3934 = vmatprep.mubr.msk.f32.mxu0 %vm4306_vm0, %v4305_v1 }
0x15dd   : > { %3932 = vmatprep.subr.mxu0 %v4305_v1 }
0x15de   : > { %3933 = vmatpush3.msra.mxu0 %v4640_v18 }
0x15df   : > { %3944 = vmatprep.subr.mxu0 %v4305_v1 }
0x169b   : > { %v2046_v22 = vpop.f32.mrf.mxu0 }
0x169c   : > { %v2051_v23 = vrot.slane %v2046_v22, 3 }
0x169d   : > { %v3922_v24 = vpop.f32.mrf.mxu0 }
0x169e   : > { %v2053_v26 = vadd.f32 %v2051_v23, %v4656_v25 }
0x16a0   : > { %4151 = vtanh.f32 %v2053_v26  ;;  %v3718_v28 = vmul.f32 -1.442695, %v2053_v26 }
0x16a2   : > { %4153 = vpow2.f32 %v3718_v28 }
0x16ad   : > { %v4152_v27 = vpop.eup %4151 }
0x16ae   : > { %2066 = vrot.lane.b32.xlu0 %v4152_v27, %s5116_s28 }
0x16af   : > { %v4154_v29 = vpop.eup %4153 }
0x16b0   : > { %v2057_v30 = vadd.f32 1.0, %v4154_v29 }
0x16b2   : > { %4155 = vrcp.f32 %v2057_v30 }
0x16bf   : > { %v4156_v31 = vpop.eup %4155 }
0x16c0   : > { %v2064_v35 = vmul.f32 %v4156_v31, %v2062_v34 }
0x1720   : > { %v2067_v32 = vpop.permute.xlu0 %2066 }
0x1721   : > { %v2069_v33 = vmul.f32 %v4156_v31, %v2067_v32 }
0x1723   : > { %2071 = vrot.lane.b32.xlu1 %v2069_v33, %s5146_s0 }
0x1795   : > { %v2072_v36 = vpop.permute.xlu1 %2071 }
0x1796   : > { %v2074_v37 = vadd.f32 %v2072_v36, %v2064_v35 }
0x1798   : > { %4157 = vtanh.f32 %v2074_v37  ;;  %v2169_v57 = vrot.slane %v2074_v37, 1 }
0x17a5   : > { %v4158_v38 = vpop.eup %4157 }
0x17a6   : > { %2077 = vrot.lane.b32.xlu0 %v4158_v38, %s5118_s24 }
0x1818   : > { %v2078_v39 = vpop.permute.xlu0 %2077 }
0x1819   : > { %v4712_v40 = vmul.f32 %v4156_v31, %v2078_v39 }
0x181b   : > { %v2082_v41 = vrot.slane %v4712_v40, 5 }
0x181d   : > { %2083 = vrot.lane.b32.xlu1 %v2082_v41, %s4310_s27 }
0x188f   : > { %v2084_v42 = vpop.permute.xlu1 %2083 }
0x1890   : > { %3928 = vmatmul.mubr.msk.f32.vlgmr.msra.gmra.mxu1 %vm742_vm1, %v2084_v42 }
0x1891   : > { %3938 = vmatpush3.msra.mxu1 %v4634_v16  ;;  %3941 = vmatprep.mubr.msk.f32.mxu1 %vm4306_vm0, %v4305_v1 }
0x1892   : > { %3939 = vmatprep.subr.mxu1 %v4305_v1 }
0x1893   : > { %3940 = vmatpush3.msra.mxu1 %v4640_v18 }
0x1894   : > { %3951 = vmatprep.subr.mxu1 %v4305_v1 }
0x1950   : > { %v2153_v43 = vpop.f32.mrf.mxu1 }
0x1951   : > { %v2158_v44 = vrot.slane %v2153_v43, 4 }
0x1952   : > { %v3929_v46 = vpop.f32.mrf.mxu1 }
0x1953   : > { %v2160_v47 = vadd.f32 %v2158_v44, %v4656_v25 }
0x1955   : > { %4159 = vtanh.f32 %v2160_v47  ;;  %v3720_v49 = vmul.f32 -1.442695, %v2160_v47 }
0x1957   : > { %4161 = vpow2.f32 %v3720_v49 }
0x1962   : > { %v4160_v48 = vpop.eup %4159 }
0x1963   : > { %2173 = vrot.lane.b32.xlu0 %v4160_v48, %s5116_s28 }
0x1964   : > { %v4162_v50 = vpop.eup %4161 }
0x1965   : > { %v2164_v51 = vadd.f32 1.0, %v4162_v50 }
0x1967   : > { %4163 = vrcp.f32 %v2164_v51 }
0x1974   : > { %v4164_v52 = vpop.eup %4163 }
0x1975   : > { %v2171_v58 = vmul.f32 %v4164_v52, %v2169_v57 }
0x19d5   : > { %v2174_v53 = vpop.permute.xlu0 %2173 }
0x19d6   : > { %v2176_v55 = vmul.f32 %v4164_v52, %v2174_v53 }
0x19d8   : > { %2178 = vrot.lane.b32.xlu1 %v2176_v55, %s5146_s0 }
0x1a4a   : > { %v2179_v59 = vpop.permute.xlu1 %2178 }
0x1a4b   : > { %v2181_v61 = vadd.f32 %v2179_v59, %v2171_v58 }
0x1a4d   : > { %4165 = vtanh.f32 %v2181_v61  ;;  %v2276_v17 = vrot.slane %v2181_v61, 1 }
0x1a5a   : > { %v4166_v62 = vpop.eup %4165 }
0x1a5b   : > { %2184 = vrot.lane.b32.xlu0 %v4166_v62, %s5118_s24 }
0x1acd   : > { %v2185_v63 = vpop.permute.xlu0 %2184 }
0x1ace   : > { %v4727_v3 = vmul.f32 %v4164_v52, %v2185_v63 }
0x1ad0   : > { %v2189_v0 = vrot.slane %v4727_v3, 4 }
0x1ad2   : > { %2190 = vrot.lane.b32.xlu1 %v2189_v0, %s4310_s27 }
0x1b44   : > { %v2191_v2 = vpop.permute.xlu1 %2190 }
0x1b45   : > { %3935 = vmatmul.mubr.msk.f32.vlgmr.msra.gmra.mxu0 %vm742_vm1, %v2191_v2 }
0x1b46   : > { %3945 = vmatpush3.msra.mxu0 %v4634_v16  ;;  %3948 = vmatprep.mubr.msk.f32.mxu0 %vm4306_vm0, %v4305_v1 }
0x1b47   : > { %3946 = vmatprep.subr.mxu0 %v4305_v1 }
0x1b48   : > { %3947 = vmatpush3.msra.mxu0 %v4640_v18 }
0x1b49   : > { %3958 = vmatprep.subr.mxu0 %v4305_v1 }
0x1c05   : > { %v2260_v4 = vpop.f32.mrf.mxu0 }
0x1c06   : > { %v2265_v6 = vrot.slane %v2260_v4, 5 }
0x1c07   : > { %v3936_v5 = vpop.f32.mrf.mxu0 }
0x1c08   : > { %v2267_v7 = vadd.f32 %v2265_v6, %v4656_v25  ;;  %v1719_v5 = vrot.slane %v4691_v60, 1 }
0x1c0a   : > { %4167 = vtanh.f32 %v2267_v7  ;;  %v3722_v9 = vmul.f32 -1.442695, %v2267_v7  ;;  %v1721_v7 = vadd.f32 %v1719_v5, %v4534_v12 }
0x1c0c   : > { %4169 = vpow2.f32 %v3722_v9 }
0x1c17   : > { %v4168_v8 = vpop.eup %4167 }
0x1c18   : > { %2280 = vrot.lane.b32.xlu0 %v4168_v8, %s5116_s28 }
0x1c19   : > { %v4170_v10 = vpop.eup %4169 }
0x1c1a   : > { %v2271_v11 = vadd.f32 1.0, %v4170_v10 }
0x1c1c   : > { %4171 = vrcp.f32 %v2271_v11 }
0x1c29   : > { %v4172_v13 = vpop.eup %4171 }
0x1c2a   : > { %v2278_v20 = vmul.f32 %v4172_v13, %v2276_v17 }
0x1c8a   : > { %v2281_v14 = vpop.permute.xlu0 %2280 }
0x1c8b   : > { %v2283_v15 = vmul.f32 %v4172_v13, %v2281_v14 }
0x1c8d   : > { %2285 = vrot.lane.b32.xlu1 %v2283_v15, %s5146_s0 }
0x1cff   : > { %v2286_v21 = vpop.permute.xlu1 %2285 }
0x1d00   : > { %v2288_v22 = vadd.f32 %v2286_v21, %v2278_v20  ;;  %v1730_v21 = vrot.slane %v4663_v45, 7 }
0x1d02   : > { %4173 = vtanh.f32 %v2288_v22 }
0x1d0f   : > { %v4174_v23 = vpop.eup %4173 }
0x1d10   : > { %2291 = vrot.lane.b32.xlu0 %v4174_v23, %s5118_s24 }
0x1d82   : > { %v2292_v24 = vpop.permute.xlu0 %2291 }
0x1d83   : > { %v4742_v26 = vmul.f32 %v4172_v13, %v2292_v24  ;;  %v3713_v13 = vmul.f32 -1.442695, %v1721_v7 }
0x1d85   : > { %v2296_v27 = vrot.slane %v4742_v26, 3 }
0x1d87   : > { %2297 = vrot.lane.b32.xlu1 %v2296_v27, %s4310_s27 }
0x1df9   : > { %v2298_v28 = vpop.permute.xlu1 %2297 }
0x1dfa   : > { %3942 = vmatmul.mubr.msk.f32.vlgmr.msra.gmra.mxu1 %vm742_vm1, %v2298_v28 }
0x1dfb   : > { %3952 = vmatpush3.msra.mxu1 %v4634_v16  ;;  %3955 = vmatprep.mubr.msk.f32.mxu1 %vm4306_vm0, %v4305_v1 }
0x1dfc   : > { %3953 = vmatprep.subr.mxu1 %v4305_v1 }
0x1dfd   : > { %3954 = vmatpush3.msra.mxu1 %v4640_v18  ;;  %v2383_v18 = vrot.slane %v2288_v22, 1 }
0x1dfe   : > { %3969 = vmatprep.subr.mxu1 %v4305_v1 }
0x1eba   : > { %v2367_v29 = vpop.f32.mrf.mxu1 }
0x1ebb   : > { %v2372_v30 = vrot.slane %v2367_v29, 6 }
0x1ebc   : > { %v3943_v31 = vpop.f32.mrf.mxu1 }
0x1ebd   : > { %v2374_v32 = vadd.f32 %v2372_v30, %v4656_v25 }
0x1ebf   : > { %4175 = vtanh.f32 %v2374_v32  ;;  %v3724_v34 = vmul.f32 -1.442695, %v2374_v32 }
0x1ec1   : > { %4177 = vpow2.f32 %v3724_v34 }
0x1ecc   : > { %v4176_v33 = vpop.eup %4175 }
0x1ecd   : > { %2387 = vrot.lane.b32.xlu0 %v4176_v33, %s5116_s28 }
0x1ece   : > { %v4178_v16 = vpop.eup %4177 }
0x1ecf   : > { %v2378_v35 = vadd.f32 1.0, %v4178_v16 }
0x1ed1   : > { %4179 = vrcp.f32 %v2378_v35 }
0x1ede   : > { %v4180_v36 = vpop.eup %4179 }
0x1edf   : > { %v2385_v39 = vmul.f32 %v4180_v36, %v2383_v18 }
0x1f3f   : > { %v2388_v37 = vpop.permute.xlu0 %2387 }
0x1f40   : > { %v2390_v38 = vmul.f32 %v4180_v36, %v2388_v37 }
0x1f42   : > { %2392 = vrot.lane.b32.xlu1 %v2390_v38, %s5146_s0 }
0x1fb4   : > { %v2393_v41 = vpop.permute.xlu1 %2392 }
0x1fb5   : > { %v2395_v42 = vadd.f32 %v2393_v41, %v2385_v39 }
0x1fb7   : > { %4181 = vtanh.f32 %v2395_v42  ;;  %v2490_v63 = vrot.slane %v2395_v42, 1 }
0x1fc4   : > { %v4182_v43 = vpop.eup %4181 }
0x1fc5   : > { %2398 = vrot.lane.b32.xlu0 %v4182_v43, %s5118_s24  ;;  %v2630_v43 = vld [vmem:[%s5147_s8 + $0x18] sm:$0xff] }
0x2037   : > { %v2399_v44 = vpop.permute.xlu0 %2398 }
0x2038   : > { %v4757_v46 = vmul.f32 %v4180_v36, %v2399_v44  ;;  %v2629_v44 = vld [vmem:[%s5147_s8 + $0x10] sm:$0xff] }
0x203a   : > { %v2403_v47 = vrot.slane %v4757_v46, 2 }
0x203c   : > { %2404 = vrot.lane.b32.xlu1 %v2403_v47, %s4310_s27  ;;  %v2628_v47 = vld [vmem:[%s5147_s8 + $0x8] sm:$0xff] }
0x20ae   : > { %v2405_v48 = vpop.permute.xlu1 %2404 }
0x20af   : > { %3949 = vmatmul.mubr.msk.f32.vlgmr.msra.gmra.mxu0 %vm742_vm1, %v2405_v48 }
0x20b0   : > { %3966 = vmatprep.mubr.msk.f32.mxu0 %vm4306_vm0, %v4305_v1  ;;  %3959 = vmatpush3.msra.mxu0 %v2630_v43  ;;  %v3294_v43 = vld [vmem:[%s5101_s21] sm:$0x3f] }
0x20b1   : > { %3960 = vmatprep.subr.mxu0 %v4305_v1 }
0x20b2   : > { %3961 = vmatpush3.msra.mxu0 %v2629_v44  ;;  %v4311_v44 = vmov 0  }
0x20b3   : > { %3962 = vmatprep.subr.mxu0 %v4305_v1  ;;  %4078 = vset.pattern.permute.xlu0 %v4311_v44 }
0x20b4   : > { %3963 = vmatpush3.msra.mxu0 %v2628_v47 }
0x20b5   : > { %3964 = vmatprep.subr.mxu0 %v4305_v1 }
0x216f   : > { %v2474_v49 = vpop.f32.mrf.mxu0 }
0x2170   : > { %v2479_v50 = vrot.slane %v2474_v49, 7  ;;  %v2627_v49 = vld [vmem:[%s5147_s8] sm:$0xff] }
0x2171   : > { %v3950_v51 = vpop.f32.mrf.mxu0  ;;  %3965 = vmatpush3.msra.mxu0 %v2627_v49 }
0x2172   : > { %v2481_v52 = vadd.f32 %v2479_v50, %v4656_v25  ;;  %3981 = vmatprep.subr.mxu0 %v4305_v1 }
0x2174   : > { %4183 = vtanh.f32 %v2481_v52  ;;  %v3726_v55 = vmul.f32 -1.442695, %v2481_v52 }
0x2176   : > { %4185 = vpow2.f32 %v3726_v55 }
0x2181   : > { %v4184_v53 = vpop.eup %4183 }
0x2182   : > { %2494 = vrot.lane.b32.xlu0 %v4184_v53, %s5116_s28 }
0x2183   : > { %v4186_v57 = vpop.eup %4185 }
0x2184   : > { %v2485_v58 = vadd.f32 1.0, %v4186_v57 }
0x2186   : > { %4187 = vrcp.f32 %v2485_v58 }
0x2193   : > { %v4188_v59 = vpop.eup %4187 }
0x2194   : > { %v2492_v0 = vmul.f32 %v4188_v59, %v2490_v63 }
0x21f4   : > { %v2495_v61 = vpop.permute.xlu0 %2494 }
0x21f5   : > { %v2497_v62 = vmul.f32 %v4188_v59, %v2495_v61 }
0x21f7   : > { %2499 = vrot.lane.b32.xlu1 %v2497_v62, %s5146_s0 }
0x2269   : > { %v2500_v2 = vpop.permute.xlu1 %2499 }
0x226a   : > { %v2502_v4 = vadd.f32 %v2500_v2, %v2492_v0  ;;  %v3731_v0 = vld [vmem:[%s5151_s11] ss:$0 sm:$0xff] }
0x226c   : > { %4189 = vtanh.f32 %v2502_v4  ;;  %v2594_v36 = vrot.slane %v2502_v4, 1 }
0x226d   : > { %4191 = vtanh.f32 %v1721_v7  ;;  %v2799_v7 = vlaneseq }
0x226e   : > { %4193 = vpow2.f32 %v3713_v13 }
0x2279   : > { %v4190_v6 = vpop.eup %4189 }
0x227a   : > { %2505 = vrot.lane.b32.xlu0 %v4190_v6, %s5118_s24  ;;  %v4192_v11 = vpop.eup %4191 }
0x227b   : > { %v4194_v14 = vpop.eup %4193 }
0x227c   : > { %v1725_v15 = vadd.f32 1.0, %v4194_v14 }
0x227e   : > { %4195 = vrcp.f32 %v1725_v15 }
0x228b   : > { %v4196_v12 = vpop.eup %4195 }
0x228c   : > { %v1732_v22 = vmul.f32 %v4196_v12, %v1730_v21  ;;  %v2908_v21 = vld [vmem:[%s5094_s14] sm:$0xff] }
0x22ec   : > { %v2506_v8 = vpop.permute.xlu0 %2505 }
0x22ed   : > { %v4770_v9 = vmul.f32 %v4188_v59, %v2506_v8  ;;  %v2800_v8 = vand.u32 127, %v2799_v7 }
0x22ef   : > { %v2510_v10 = vrot.slane %v4770_v9, 1 }
0x22f1   : > { %2511 = vrot.lane.b32.xlu1 %v2510_v10, %s4310_s27 }
0x22f5   : > { %1734 = vrot.lane.b32.xlu1 %v4192_v11, %s5116_s28 }
0x2363   : > { %v2512_v17 = vpop.permute.xlu1 %2511 }
0x2364   : > { %3956 = vmatmul.mubr.msk.f32.vlgmr.msra.gmra.mxu1 %vm742_vm1, %v2512_v17 }
0x2365   : > { %3973 = vmatprep.mubr.msk.f32.mxu1 %vm4306_vm0, %v4305_v1 }
0x2367   : > { %v1735_v60 = vpop.permute.xlu1 %1734 }
0x2368   : > { %v1737_v20 = vmul.f32 %v4196_v12, %v1735_v60 }
0x236a   : > { %1739 = vrot.lane.b32.xlu1 %v1737_v20, %s5146_s0  ;;  %v2827_v20 = vld [vmem:[%s5092_s12] sm:$0x1f] }
0x23dc   : > { %v1740_v23 = vpop.permute.xlu1 %1739 }
0x23dd   : > { %v1742_v24 = vadd.f32 %v1740_v23, %v1732_v22  ;;  %v4854_v22 = vshrl.u32 %v2799_v7, 7 }
0x23df   : > { %4197 = vtanh.f32 %v1742_v24 }
0x23ec   : > { %v4198_v27 = vpop.eup %4197 }
0x23ed   : > { %1745 = vrot.lane.b32.xlu1 %v4198_v27, %s5118_s24 }
0x2424   : > { %v2581_v28 = vpop.f32.mrf.mxu1 }
0x2425   : > { %v2585_v29 = vadd.f32 %v2581_v28, %v4656_v25  ;;  %v2820_v28 = vsub.s32 %v2800_v8, %v4854_v22 }
0x2426   : > { %v3957_v30 = vpop.f32.mrf.mxu1 }
0x2427   : > { %4199 = vtanh.f32 %v2585_v29  ;;  %v3728_v32 = vmul.f32 -1.442695, %v2585_v29 }
0x2429   : > { %4201 = vpow2.f32 %v3728_v32  ;;  %v2907_v32 = vld [vmem:[%s5093_s13 + $0x18] sm:$0xff] }
0x2434   : > { %v4200_v31 = vpop.eup %4199 }
0x2435   : > { %2598 = vrot.lane.b32.xlu0 %v4200_v31, %s5116_s28  ;;  %s5148_s28 = smov 96  }
0x2436   : > { %v4202_v33 = vpop.eup %4201 }
0x2437   : > { %v2589_v34 = vadd.f32 1.0, %v4202_v33 }
0x2439   : > { %4203 = vrcp.f32 %v2589_v34  ;;  %v2906_v34 = vld [vmem:[%s5093_s13 + $0x10] sm:$0xff] }
0x2446   : > { %v4204_v45 = vpop.eup %4203 }
0x2447   : > { %v2596_v37 = vmul.f32 %v4204_v45, %v2594_v36 }
0x245f   : > { %v1746_v25 = vpop.permute.xlu1 %1745 }
0x2460   : > { %v1748_v41 = vmul.f32 %v4196_v12, %v1746_v25  ;;  %v3063_v25 = vld [vmem:[%s5096_s16 + $0x8] sm:$0xff] }
0x2462   : > { %v1762_v42 = vsel %vm1761_vm9, %v4670_v54, %v1748_v41  ;;  %v3062_v41 = vld [vmem:[%s5096_s16] sm:$0xff] }
0x24a7   : > { %v2599_v16 = vpop.permute.xlu0 %2598 }
0x24a8   : > { %v2601_v35 = vmul.f32 %v4204_v45, %v2599_v16  ;;  %v2904_v16 = vld [vmem:[%s5093_s13] sm:$0xff] }
0x24aa   : > { %2603 = vrot.lane.b32.xlu0 %v2601_v35, %s5146_s0  ;;  %v3066_v35 = vld [vmem:[%s5097_s17] sm:$0xff]  ;;  %s5152_s0 = sld [smem:[#allocation17_spill]] }
0x251c   : > { %v2604_v38 = vpop.permute.xlu0 %2603 }
0x251d   : > { %v2606_v18 = vadd.f32 %v2604_v38, %v2596_v37  ;;  %v3065_v38 = vld [vmem:[%s5096_s16 + $0x18] sm:$0xff] }
0x251f   : > { %4205 = vtanh.f32 %v2606_v18  ;;  %v3064_v18 = vld [vmem:[%s5096_s16 + $0x10] sm:$0xff] }
0x252c   : > { %v4206_v39 = vpop.eup %4205 }
0x252d   : > { %2609 = vrot.lane.b32.xlu0 %v4206_v39, %s5118_s24  ;;  %s715_s24 = scalar_lea.vmem [#allocation5], %s4858_s2 }
0x252e   : > { %s3578_s1 = sshll.u32 %s715_s24, 4  ;;  %s3579_s1 = int_to_ptr.vmem [resolvable:$true] %s3578_s1 }
0x252f   : > { %s4213_s11 = scalar_lea.vmem %s3579_s1, 16 }
0x2530   : > { %p4214_p11 = scmp.ne.s32.totalorder %s3579_s1, %s4213_s11 }
0x2531   : > { %1764 = vrot.lane.b32.xlu0 %v1762_v42, %s4310_s27  ;;  %s729_s27 = scalar_lea.vmem %s5152_s0, %s4495_s6  ;;  %s4312_s6 = smov [#allocation5]  }
0x2532   : > { %p4215_p12 = pnand %p4214_p11, %p4474_p5  ;;  %s4217_s4 = sshll.u32 %s4312_s6, 4  ;;  %s4218_s4 = int_to_ptr.vmem [resolvable:$false] %s4217_s4 }
0x2533   : > { %s4219_s29 = scalar_lea.vmem %s4218_s4, 32  ;;  %p4220_p0 = scmp.lt.s32.totalorder %s3579_s1, %s4218_s4 }
0x2534   : > { %p4216_p13 = pneg %p4215_p12  ;;  %p4221_p1 = scmp.lt.s32.totalorder %s4219_s29, %s4213_s11 }
0x2536   : > { %p4222_p2 = por %p4221_p1, %p4220_p0 }
0x2538   : > { %p4223_p3 = pnand %p4222_p2, %p4216_p13 }
0x259f   : > { %v2610_v48 = vpop.permute.xlu0 %2609 }
0x25a0   : > { %v2612_v54 = vmul.f32 %v4204_v45, %v2610_v48  ;;  %v2905_v45 = vld [vmem:[%s5093_s13 + $0x8] sm:$0xff]  ;;  %v3738_v48 = vld [vmem:[%s5095_s15] ss:$0 sm:$0xff] }
0x25a2   : > { %v2613_v50 = vsel %vm1749_vm3, %v2612_v54, %v4770_v9  ;;  %vm2909_vm3 = vcmask 64512  }
0x25a3   : > { %v2614_v51 = vsel %vm1751_vm4, %v2613_v50, %v4757_v46  ;;  %v1765_v52 = vpop.permute.xlu0 %1764 }
0x25a4   : > { %v2615_v53 = vsel %vm1753_vm5, %v2614_v51, %v4742_v26  ;;  %1767 = vst.msk [vmem:[#allocation4] sm:$0xff] %vm742_vm1, %v1765_v52 }
0x25a5   : > { %v2616_v55 = vsel %vm1755_vm6, %v2615_v53, %v4727_v3 }
0x25a6   : > { %v2617_v57 = vsel %vm1757_vm7, %v2616_v55, %v4712_v40  ;;  %v3729_v40 = vld [vmem:[%s5150_s9] ss:$0 sm:$0xff] }
0x25a7   : > { %v2618_v58 = vsel %vm1759_vm8, %v2617_v57, %v4697_v19  ;;  %v2714_v19 = vld [vmem:[%s5149_s10 + $0x8] sm:$0xff]  ;;  %v3741_v55 = vld [vmem:[%s5098_s18] ss:$0 sm:$0xff] }
0x25a8   : > { %v2619_v46 = vsel %vm1761_vm9, %v2618_v58, %v4672_v56  ;;  %v2713_v56 = vld [vmem:[%s5149_s10] sm:$0xff]  ;;  %3970 = vmatpush3.msra.mxu1 %v2714_v19  ;;  %s3561_s10 = scalar_lea.sflag [#allocation6], %s4858_s2 }
0x25a9   : > { %2621 = vrot.lane.b32.xlu1 %v2619_v46, %s5148_s28  ;;  %3971 = vmatprep.subr.mxu1 %v4305_v1  ;;  %s3746_s28 = sshll.u32 %s4457_s5, 4 }
0x25aa   : > { %3972 = vmatpush3.msra.mxu1 %v2713_v56  ;;  %v3293_v56 = vld [vmem:[%s5100_s20] sm:$0x3f]  ;;  %s3576_s9 = scalar_lea.hbm %s5102_s22, %s3746_s28 }
0x25ab   : > { %3976 = vmatprep.subr.mxu1 %v4305_v1 }
0x261b   : > { %v2622_v26 = vpop.permute.xlu1 %2621 }
0x261c   : > { %2625 = vst.msk [vmem:[#allocation4] sm:$0xff] %vm2624_vm10, %v2622_v26 }
0x2623   : > { %v4820_v59 = vld [vmem:[#allocation4] sm:$0xff] }
0x2624   : > { %3967 = vmatmul.mubr.msk.f32.vlgmr.msra.gmra.mxu0 %vm2638_vm11, %v4820_v59 }
0x2625   : > { %3983 = vmatprep.mubr.msk.f32.mxu0 %vm4306_vm0, %v4305_v1  ;;  %3982 = vmatpush3.msra.mxu0 %v2908_v21 }
0x2626   : > { %3997 = vmatprep.subr.mxu0 %v4305_v1 }
0x26e4   : > { %v2708_v3 = vpop.f32.mrf.mxu0 }
0x26e5   : > { %v2709_v61 = vadd.f32 %v3729_v40, %v2708_v3 }
0x26e6   : > { %v3968_v62 = vpop.f32.mrf.mxu0 }
0x26e7   : > { %4207 = vtanh.f32 %v2709_v61 }
0x26f4   : > { %v4208_v63 = vpop.eup %4207 }
0x26f5   : > { %3974 = vmatmul.mubr.msk.f32.vlgmr.msra.gmra.mxu1 %vm742_vm1, %v4208_v63 }
0x26f6   : > { %3978 = vmatprep.mubr.msk.f32.mxu1 %vm4306_vm0, %v4305_v1  ;;  %3977 = vmatpush3.msk.msra.mxu1 %vm1757_vm7, %v2827_v20 }
0x26f7   : > { %3986 = vmatprep.subr.mxu1 %v4305_v1 }
0x27b5   : > { %v2791_v2 = vpop.f32.mrf.mxu1 }
0x27b6   : > { %v2792_v4 = vadd.f32 %v3731_v0, %v2791_v2  ;;  %v4938_v0 = vsub.s32 0, %v4854_v22 }
0x27b7   : > { %v3975_v6 = vpop.f32.mrf.mxu1 }
0x27b8   : > { %v2796_v5 = vsel %vm2795_vm12, %v2792_v4, -inf }
0x27b9   : > { %2797 = vmax.xlane.f32.xlu0 %v2796_v5  ;;  %v3392_v5 = vsub.s32 2, %v4854_v22 }
0x2842   : > { %v2798_v9 = vpop.xlane.xlu0 %2797 }
0x2843   : > { %vm2801_vm13 = vcmp.eq.f32.partialorder %v2792_v4, %v2798_v9  ;;  %v3385_v4 = vsub.s32 1, %v4854_v22 }
0x2844   : > { %v2802_v10 = vsel %vm2801_vm13, %v2800_v8, 5 }
0x2845   : > { %v2803_v11 = vsel %vm2795_vm12, %v2802_v10, 2147483647  ;;  %v3406_v10 = vsub.s32 4, %v4854_v22 }
0x2846   : > { %v2805_v13 = vshra.s32 %v2803_v11, 16  ;;  %v2804_v15 = vand.u32 65535, %v2803_v11 }
0x2848   : > { %v2807_v14 = vcvt.s32.f32 %v2805_v13  ;;  %v2806_v12 = vcvt.s32.f32 %v2804_v15  ;;  %v3413_v13 = vsub.s32 5, %v4854_v22 }
0x284a   : > { %2808 = vmin.xlane.f32.xlu1 %v2807_v14 }
0x28d3   : > { %v2809_v17 = vpop.xlane.xlu1 %2808 }
0x28d4   : > { %vm2810_vm14 = vcmp.eq.f32.partialorder %v2807_v14, %v2809_v17  ;;  %v2815_v23 = vcvt.f32.s32 %v2809_v17  ;;  %v3502_v14 = vld [vmem:[%s729_s27] sm:$0x1] }
0x28d5   : > { %v2811_v60 = vsel %vm2810_vm14, %v2806_v12, inf  ;;  %v3506_v17 = vrot.slane %v3502_v14, %v4938_v0 }
0x28d6   : > { %2812 = vmin.xlane.f32.xlu0 %v2811_v60  ;;  %v2816_v27 = vshll.u32 %v2815_v23, 16 }
0x28ec   : > { %3297 = vperm.xlu0 %4078, %v3294_v43  }
0x295f   : > { %v2813_v24 = vpop.xlane.xlu0 %2812 }
0x2960   : > { %v2814_v29 = vcvt.f32.s32 %v2813_v24 }
0x2962   : > { %v2817_v30 = vadd.s32 %v2816_v27, %v2814_v29 }
0x2964   : > { %v2821_v31 = vrot.slane %v2817_v30, %v2820_v28  ;;  %vm2824_vm2 = vcmp.eq.s32.totalorder %v2800_v8, %v2817_v30  ;;  %v3399_v8 = vsub.s32 3, %v4854_v22 }
0x2965   : > { %v3733_v33 = vsel %vm2824_vm2, 1.0, %v4305_v1 }
0x2966   : > { %3979 = vmatmul.mubr.msk.f32.vlgmr.msra.gmra.mxu1 %vm2795_vm12, %v3733_v33  ;;  %2823 = vst.msk [vmem:[%s715_s24] sm:$0x1] %vm2822_vm15, %v2821_v31 }
0x2967   : > { %3987 = vmatpush3.msra.mxu1 %v2907_v32  ;;  %3994 = vmatprep.mubr.msk.f32.mxu1 %vm4306_vm0, %v4305_v1  ;;  %v3298_v61 = vpop.permute.xlu0 %3297 }
0x2968   : > { %3988 = vmatprep.subr.mxu1 %v4305_v1 }
0x2969   : > { %3989 = vmatpush3.msra.mxu1 %v2906_v34 }
0x296a   : > { %3990 = vmatprep.subr.mxu1 %v4305_v1 }
0x296b   : > { %3991 = vmatpush3.msra.mxu1 %v2905_v45 }
0x296c   : > { %3992 = vmatprep.subr.mxu1 %v4305_v1 }
0x296d   : > { %3993 = vmatpush3.msra.mxu1 %v2904_v16 }
0x296e   : > { %3995 = vmatmul.mubr.msk.f32.vlgmr.msra.gmra.mxu1 %vm2638_vm11, %v4820_v59  ;;  %4013 = vmatprep.subr.mxu1 %v4305_v1 }
0x296f   : > { %4015 = vmatprep.mubr.msk.f32.mxu1 %vm4306_vm0, %v4305_v1 }
0x2a26   : > { %v2900_v36 = vpop.f32.mrf.mxu1 }
0x2a27   : > { %3984 = vmatmul.mubr.msk.f32.vlgmr.msra.gmra.mxu0 %vm2909_vm3, %v2900_v36 }
0x2a28   : > { %v3980_v37 = vpop.f32.mrf.mxu1  ;;  %3998 = vmatpush3.msra.mxu0 %v3066_v35  ;;  %3999 = vmatprep.mubr.msk.f32.mxu0 %vm4306_vm0, %v4305_v1 }
0x2a29   : > { %4002 = vmatprep.subr.mxu0 %v4305_v1 }
0x2a2b   : > { %4000 = vmatmul.mubr.msk.f32.vlgmr.msra.gmra.mxu0 %vm2909_vm3, %v2900_v36 }
0x2a2c   : > { %4003 = vmatpush3.msra.mxu0 %v3065_v38  ;;  %4010 = vmatprep.mubr.msk.f32.mxu0 %vm4306_vm0, %v4305_v1 }
0x2a2d   : > { %4004 = vmatprep.subr.mxu0 %v4305_v1 }
0x2a2e   : > { %v3049_v39 = vpop.f32.mrf.mxu1  ;;  %4005 = vmatpush3.msra.mxu0 %v3064_v18 }
0x2a2f   : > { %4006 = vmatprep.subr.mxu0 %v4305_v1 }
0x2a30   : > { %v3996_v42 = vpop.f32.mrf.mxu1  ;;  %4007 = vmatpush3.msra.mxu0 %v3063_v25 }
0x2a31   : > { %4008 = vmatprep.subr.mxu0 %v4305_v1 }
0x2a32   : > { %4009 = vmatpush3.msra.mxu0 %v3062_v41 }
0x2a33   : > { %4011 = vmatmul.mubr.msk.f32.vlgmr.msra.gmra.mxu0 %vm2638_vm11, %v4820_v59  ;;  %v3216_v59 = vld [vmem:[%s5099_s19] sm:$0x3f] }
0x2ae7   : > { %v2979_v47 = vpop.f32.mrf.mxu0 }
0x2ae8   : > { %v3050_v54 = vadd.f32 %v3049_v39, %v2979_v47 }
0x2ae9   : > { %v3985_v49 = vpop.f32.mrf.mxu0 }
0x2aea   : > { %v3060_v50 = vadd.f32 %v3738_v48, %v3050_v54 }
0x2aeb   : > { %v3133_v51 = vpop.f32.mrf.mxu0 }
0x2aec   : > { %4209 = vtanh.f32 %v3060_v50 }
0x2aed   : > { %v4001_v52 = vpop.f32.mrf.mxu0 }
0x2af3   : > { %v3203_v53 = vpop.f32.mrf.mxu0 }
0x2af4   : > { %v3204_v57 = vadd.f32 %v3203_v53, %v3133_v51 }
0x2af5   : > { %v4012_v58 = vpop.f32.mrf.mxu0 }
0x2af6   : > { %v3214_v46 = vadd.f32 %v3741_v55, %v3204_v57 }
0x2af8   : > { %4211 = vtanh.f32 %v3214_v46 }
0x2af9   : > { %v4210_v26 = vpop.eup %4209 }
0x2afa   : > { %4014 = vmatpush3.xpose.msk.msra.mxu1 %vm742_vm1, %v4210_v26 }
0x2afb   : > { %4018 = vmatprep.subr.mxu1 %v4305_v1 }
0x2afd   : > { %4016 = vmatmul.mubr.msk.f32.vlgmr.msra.gmra.mxu1 %vm742_vm1, %v3216_v59 }
0x2afe   : > { %4020 = vmatprep.mubr.msk.f32.mxu1 %vm4306_vm0, %v4305_v1 }
0x2b05   : > { %v4212_v19 = vpop.eup %4211 }
0x2b06   : > { %4019 = vmatpush3.xpose.msk.msra.mxu1 %vm742_vm1, %v4212_v19 }
0x2b09   : > { %4021 = vmatmul.mubr.msk.f32.vlgmr.msra.gmra.mxu1 %vm742_vm1, %v3293_v56 }
0x2bbd   : > { %v4935_v40 = vpop.f32.mrf.mxu1 }
0x2bbf   : > { %v4017_v3 = vpop.f32.mrf.mxu1 }
0x2bc9   : > { %v3372_v62 = vpop.f32.mrf.mxu1 }
0x2bca   : > { %v3373_v63 = vadd.f32 %v3372_v62, %v3298_v61 }
0x2bcb   : > { %v4022_v1 = vpop.f32.mrf.mxu1 }
0x2bcc   : > { %v3379_v2 = vrot.slane %v3373_v63, %v4938_v0  ;;  %v3386_v6 = vrot.slane %v3373_v63, %v3385_v4  ;;  %v3393_v7 = vrot.slane %v3373_v63, %v3392_v5  ;;  %v3400_v9 = vrot.slane %v3373_v63, %v3399_v8 }
0x2bcd   : > { %v3407_v11 = vrot.slane %v3373_v63, %v3406_v10  ;;  %v3414_v15 = vrot.slane %v3373_v63, %v3413_v13 }
0x2bce   : > { %3381 = vbcast.lane.b32.xlu1 %v3379_v2, 256 }
0x2bd2   : > { %3388 = vbcast.lane.b32.xlu1 %v3386_v6, 256 }
0x2bd6   : > { %3395 = vbcast.lane.b32.xlu1 %v3393_v7, 256 }
0x2bda   : > { %3402 = vbcast.lane.b32.xlu1 %v3400_v9, 256 }
0x2bde   : > { %3409 = vbcast.lane.b32.xlu1 %v3407_v11, 256 }
0x2be2   : > { %3416 = vbcast.lane.b32.xlu1 %v3414_v15, 256 }
0x2be6   : > { %3508 = vbcast.lane.b32.xlu1 %v3506_v17, 256 }
0x2be7   : > { %4226 = shalt.err (!%p4223_p3)
}
0x2be8   : > { %s4227_s24 = scalar_lea.hbm %s3576_s9, 16  ;;  %s4231_s0 = scalar_lea.hbm %s5102_s22, 32 }
0x2be9   : > { %p4228_p4 = scmp.ne.s32.totalorder %s3576_s9, %s4227_s24  ;;  %p4232_p9 = scmp.lt.s32.totalorder %s3576_s9, %s5102_s22 }
0x2bea   : > { %p4233_p10 = scmp.lt.s32.totalorder %s4231_s0, %s4227_s24 }
0x2beb   : > { %p4229_p7 = pnand %p4228_p4, %p4474_p5 }
0x2bec   : > { %p4234_p11 = por %p4233_p10, %p4232_p9 }
0x2bed   : > { %p4230_p8 = pneg %p4229_p7 }
0x2bef   : > { %p4235_p12 = pnand %p4234_p11, %p4230_p8 }
0x2bf1   : > { %4238 = shalt.err (!%p4235_p12)
}
0x2bf2   : > { %4025 = dma.vmem_to_hbm [thread:$0]  (%p4474_p5), %s3579_s1, 16, %s3576_s9, %s3561_s10   ;;  %v4313_v12 = vmov 1966171168   ;;  %v3419_v29 = vcombine.high %v4935_v40, %v4935_v40  ;;  %vm3511_vm0 = vcmp.gt.f32.partialorder %v3502_v14, 0.0 }
0x2bf3   : > { %v3421_v60 = vunpack.c.l.s4 %v4313_v12  ;;  %v3514_v16 = vsel %vm3511_vm0, 1, %v4311_v44  ;;  %s4023_s9 = smul.u32 12, %s4858_s2  ;;  %s3565_s29 = scalar_lea.sflag [#allocation8], %s4858_s2 }
0x2bf4   : > { %s4024_s11 = smul.u32 192, %s4457_s5  ;;  %s4314_s8 = smov [#allocation7]  }
0x2bf5   : > { %v3422_v20 = vunpack.c.0.s8 %v3421_v60  ;;  %s722_s10 = scalar_lea.vmem [#allocation7], %s4023_s9  ;;  %s4243_s3 = sshll.u32 %s4314_s8, 4  ;;  %s4244_s3 = int_to_ptr.vmem [resolvable:$false] %s4243_s3 }
0x2bf6   : > { %s3591_s1 = sshll.u32 %s722_s10, 4  ;;  %s5031_s4 = scalar_lea.hbm %s5103_s23, %s4024_s11  ;;  %s5034_s1 = int_to_ptr.vmem [resolvable:$true] %s3591_s1 }
0x2bf7   : > { %v3425_v23 = vsub.s32 %v3422_v20, %v4854_v22  ;;  %v3518_v22 = vrot.slane %v3514_v16, %v4938_v0  ;;  %s4239_s24 = scalar_lea.vmem %s5034_s1, 192  ;;  %s4245_s0 = scalar_lea.vmem %s4244_s3, 384 }
0x2bf8   : > { %p4240_p13 = scmp.ne.s32.totalorder %s5034_s1, %s4239_s24  ;;  %p4246_p2 = scmp.lt.s32.totalorder %s5034_s1, %s4244_s3 }
0x2bf9   : > { %v3426_v27 = vrot.slane %v4935_v40, %v3425_v23  ;;  %v3433_v32 = vrot.slane %v3419_v29, %v3425_v23  ;;  %vm3519_vm1 = vcmp.eq.s32.totalorder %v3518_v22, 1  ;;  %p4247_p3 = scmp.lt.s32.totalorder %s4245_s0, %s4239_s24 }
0x2bfa   : > { %p4241_p0 = pnand %p4240_p13, %p4474_p5 }
0x2bfb   : > { %v3434_v30 = vcombine.high %v3426_v27, %v3426_v27  ;;  %v3442_v33 = vrot.slane %v3426_v27, %v3425_v23  ;;  %v3435_v35 = vcombine.high %v3433_v32, %v3433_v32  ;;  %v3449_v18 = vrot.slane %v3433_v32, %v3425_v23  ;;  %p4248_p4 = por %p4247_p3, %p4246_p2 }
0x2bfc   : > { %p4242_p1 = pneg %p4241_p0 }
0x2bfd   : > { %v3456_v34 = vrot.slane %v3434_v30, %v3425_v23  ;;  %v3464_v36 = vcombine.high %v3442_v33, %v3442_v33  ;;  %v3469_v38 = vrot.slane %v3442_v33, %v4938_v0  ;;  %v3463_v41 = vrot.slane %v3435_v35, %v3425_v23 }
0x2bfe   : > { %v3485_v49 = vrot.slane %v3449_v18, %v4938_v0  ;;  %p4249_p7 = pnand %p4248_p4, %p4242_p1 }
0x2bff   : > { %v3465_v37 = vcombine.high %v3456_v34, %v3456_v34  ;;  %v3473_v39 = vrot.slane %v3456_v34, %v4938_v0  ;;  %v3477_v43 = vrot.slane %v3464_v36, %v4938_v0  ;;  %v3489_v52 = vrot.slane %v3463_v41, %v4938_v0 }
0x2c01   : > { %v3481_v48 = vrot.slane %v3465_v37, %v4938_v0 }
0x2c40   : > { %v3382_v21 = vpop.permute.xlu1 %3381 }
0x2c41   : > { %v3496_v42 = vadd.f32 %v3469_v38, %v3382_v21 }
0x2c43   : > { %vm3521_vm5 = vcmp.gt.f32.partialorder %v3496_v42, 0.0 }
0x2c44   : > { %v3389_v24 = vpop.permute.xlu1 %3388 }
0x2c45   : > { %v3497_v47 = vadd.f32 %v3473_v39, %v3389_v24 }
0x2c47   : > { %vm3522_vm7 = vcmp.gt.f32.partialorder %v3497_v47, 0.0 }
0x2c48   : > { %v3396_v28 = vpop.permute.xlu1 %3395 }
0x2c49   : > { %v3498_v54 = vadd.f32 %v3477_v43, %v3396_v28 }
0x2c4b   : > { %vm3523_vm9 = vcmp.gt.f32.partialorder %v3498_v54, 0.0 }
0x2c4c   : > { %v3403_v31 = vpop.permute.xlu1 %3402 }
0x2c4d   : > { %v3499_v51 = vadd.f32 %v3481_v48, %v3403_v31 }
0x2c4f   : > { %vm3524_vm11 = vcmp.gt.f32.partialorder %v3499_v51, 0.0 }
0x2c50   : > { %v3410_v45 = vpop.permute.xlu1 %3409 }
0x2c51   : > { %v3500_v53 = vadd.f32 %v3485_v49, %v3410_v45 }
0x2c53   : > { %vm3525_vm13 = vcmp.gt.f32.partialorder %v3500_v53, 0.0 }
0x2c54   : > { %v3417_v25 = vpop.permute.xlu1 %3416 }
0x2c55   : > { %v3501_v55 = vadd.f32 %v3489_v52, %v3417_v25 }
0x2c57   : > { %vm3526_vm15 = vcmp.gt.f32.partialorder %v3501_v55, 0.0 }
0x2c58   : > { %v3509_v50 = vpop.permute.xlu1 %3508 }
0x2c59   : > { %vm3510_vm4 = vcmp.gt.f32.partialorder %v3509_v50, 0.0 }
0x2c5a   : > { %vm3520_vm6 = vmand %vm3510_vm4, %vm3519_vm1  ;;  %vm3553_vm1 = vcmask 58368  }
0x2c5b   : > { %vm3529_vm8 = vmand %vm3521_vm5, %vm3520_vm6 }
0x2c5c   : > { %vm4982_vm10 = vmand %vm3522_vm7, %vm3520_vm6 }
0x2c5d   : > { %vm4986_vm12 = vmand %vm3523_vm9, %vm3520_vm6 }
0x2c5e   : > { %vm4991_vm14 = vmand %vm3524_vm11, %vm3520_vm6 }
0x2c5f   : > { %vm4995_vm2 = vmand %vm3525_vm13, %vm3520_vm6 }
0x2c60   : > { %vm4999_vm3 = vmand %vm3526_vm15, %vm3520_vm6 }
0x2c61   : > { %vm3535_vm0 = vmpackc.low %vm3529_vm8, %vm3529_vm8 }
0x2c62   : > { %vm3536_vm4 = vmpackc.even %vm3535_vm0, %vm3535_vm0 }
0x2c63   : > { %vm3537_vm5 = vmpackc.low %vm4982_vm10, %vm4982_vm10  ;;  %v3547_v19 = vsel %vm3536_vm4, 16843009, %v4311_v44 }
0x2c64   : > { %vm3538_vm7 = vmpackc.even %vm3537_vm5, %vm3537_vm5  ;;  %3554 = vst.msk [vmem:[%s722_s10] sm:$0x3] %vm3553_vm1, %v3547_v19 }
0x2c65   : > { %vm3539_vm6 = vmpackc.low %vm4986_vm12, %vm4986_vm12  ;;  %v3548_v56 = vsel %vm3538_vm7, 16843009, %v4311_v44 }
0x2c66   : > { %vm3540_vm9 = vmpackc.even %vm3539_vm6, %vm3539_vm6  ;;  %3555 = vst.msk [vmem:[%s722_s10 + $0x2] sm:$0x3] %vm3553_vm1, %v3548_v56 }
0x2c67   : > { %vm3541_vm8 = vmpackc.low %vm4991_vm14, %vm4991_vm14  ;;  %v3549_v40 = vsel %vm3540_vm9, 16843009, %v4311_v44 }
0x2c68   : > { %vm3542_vm10 = vmpackc.even %vm3541_vm8, %vm3541_vm8  ;;  %3556 = vst.msk [vmem:[%s722_s10 + $0x4] sm:$0x3] %vm3553_vm1, %v3549_v40 }
0x2c69   : > { %vm3543_vm11 = vmpackc.low %vm4995_vm2, %vm4995_vm2  ;;  %v3550_v3 = vsel %vm3542_vm10, 16843009, %v4311_v44 }
0x2c6a   : > { %vm3544_vm12 = vmpackc.even %vm3543_vm11, %vm3543_vm11  ;;  %3557 = vst.msk [vmem:[%s722_s10 + $0x6] sm:$0x3] %vm3553_vm1, %v3550_v3 }
0x2c6b   : > { %vm3545_vm13 = vmpackc.low %vm4999_vm3, %vm4999_vm3  ;;  %v3551_v61 = vsel %vm3544_vm12, 16843009, %v4311_v44 }
0x2c6c   : > { %vm3546_vm14 = vmpackc.even %vm3545_vm13, %vm3545_vm13  ;;  %3558 = vst.msk [vmem:[%s722_s10 + $0x8] sm:$0x3] %vm3553_vm1, %v3551_v61 }
0x2c6d   : > { %v3552_v62 = vsel %vm3546_vm14, 16843009, %v4311_v44 }
0x2c6e   : > { %3559 = vst.msk [vmem:[%s722_s10 + $0xa] sm:$0x3] %vm3553_vm1, %v3552_v62 }
0x2c6f   : > { %4252 = shalt.err (!%p4249_p7)
}
0x2c70   : > { %s4253_s27 = scalar_lea.hbm %s5031_s4, 192  ;;  %s4257_s10 = scalar_lea.hbm %s5103_s23, 384 }
0x2c71   : > { %p4254_p8 = scmp.ne.s32.totalorder %s5031_s4, %s4253_s27  ;;  %p4258_p11 = scmp.lt.s32.totalorder %s5031_s4, %s5103_s23 }
0x2c72   : > { %p4259_p12 = scmp.lt.s32.totalorder %s4257_s10, %s4253_s27 }
0x2c73   : > { %p4255_p9 = pnand %p4254_p8, %p4474_p5 }
0x2c74   : > { %p4260_p13 = por %p4259_p12, %p4258_p11 }
0x2c75   : > { %p4256_p10 = pneg %p4255_p9 }
0x2c77   : > { %p4261_p0 = pnand %p4260_p13, %p4256_p10 }
0x2c79   : > { %4264 = shalt.err (!%p4261_p0)
}
0x2c7a   : > { %s4315_s6 = smov 2   ;;  %s5163_s24 = smov 32  }
0x2c7b   : > { %4026 = dma.vmem_to_hbm [thread:$0]  (%p4474_p5), %s5034_s1, 192, %s5031_s4, %s3565_s29, %s5163_s24, %s5163_s24, %s4315_s6  }
0x2c7c PF: > { %s5164_s8 = sld [smem:[#allocation11_spill]]  ;;  %p4036_p1 = scmp.ge.s32.totalorder %s4303_s25, 2 }
0x2c7e   : > { %p4030_p2 = pnand %p4036_p1, %p4478_p6 }
0x2c80   : > { %p4031_p3 = pneg %p4030_p2 }
0x2c82   : > { %s3606_s0 = sand.u32 1, %s5164_s8  }
0x2c83   : > { %s3607_s27 = scalar_lea.sflag [#allocation6], %s3606_s0 }
0x2c84   : > { %4282 = dma.done.wait (%p4031_p3), %s3607_s27, 16  }
0x2c85   : > { %4284 = vsyncadd (%p4031_p3), %s3607_s27, 4294967280  ;;  %s3615_s7 = scalar_lea.sflag [#allocation8], %s3606_s0 }
0x2c86   : > { %4286 = dma.done.wait (%p4031_p3), %s3615_s7, 192  }
0x2c87   : > { %4288 = vsyncadd (%p4031_p3), %s3615_s7, 4294967104  ;;  %s5166_s25 = sld [smem:[#allocation13_spill]]  ;;  %s5169_s4 = smov %s4295_s30 }
0x2c88   : > { %s5167_s2 = sld [smem:[#allocation12_spill]] }
0x2c89   : > { %s5168_s24 = sld [smem:[#allocation14_spill]] }
0x2c8d   : > { %p37_p5 = scmp.ge.s32.totalorder %s5166_s25, 4  }
0x2c8e   : > { %s5170_s30 = smov %s5167_s2 }
0x2c8f   :  { %39 = sbr.rel (!%p37_p5) target bundleno = 18 (0x12), region = 163 }
0x2c94   :  { %3620 = vsyncpa [#allocation6], 1 }
0x2c95   :  { %3622 = vsyncpa [#allocation6 + $0x1], 1 }
0x2c96   :  { %3623 = vsyncpa [#allocation8], 1 }
0x2c97   :  { %3625 = vsyncpa [#allocation8 + $0x1], 1 }

</bundles_post_ra>
